<compile_context>
chip_gen: v7x
topology: tpu7x:2x2x1
jax: 0.10.0
libtpu: 0.0.40
codegen_flags: <defaults>
</compile_context>

<pallas_src>
import math

import jax
import jax.numpy as jnp
import numpy as np
from jax.experimental import pallas as pl
from jax.experimental.pallas import tpu as pltpu


_VMEM_SPEC = pl.BlockSpec(memory_space=pltpu.MemorySpace.VMEM)


# ----------------------------------------------------------------------------
# Fused Pallas kernel: stacked LSTM (wavefront) over the sequence + final linear
# ----------------------------------------------------------------------------
def make_fused_lstm_kernel(T, B, H, num_layers):
    """Kernel refs (all VMEM):

      x_ref         : (T*B, E)   bf16, time-major rows (t, b)
      per layer l   : w_ih_t (D_in, 4H) bf16, w_hh_t (H, 4H) bf16, bias (1,4H) f32
                      (PyTorch gate column order i, f, g, o)
      lin_w_ref     : (H, C_pad) bf16
      lin_b_ref     : (1, C_pad) f32
      o_ref         : (B, C_pad) f32 output (lane-dense slab)
      xp_ref scratch: (T*B, 4H)  f32 hoisted layer-0 input projection
    """

    def kernel(*refs):
        x_ref = refs[0]
        layer_refs = refs[1:1 + 3 * num_layers]
        lin_w_ref = refs[1 + 3 * num_layers]
        lin_b_ref = refs[2 + 3 * num_layers]
        o_ref = refs[3 + 3 * num_layers]
        xp_ref = refs[4 + 3 * num_layers]

        w_ih = [layer_refs[3 * l][...] for l in range(num_layers)]       # bf16
        w_hh = [layer_refs[3 * l + 1][...] for l in range(num_layers)]   # bf16
        bias = [layer_refs[3 * l + 2][...] for l in range(num_layers)]   # f32

        # Layer-0 input projection hoisted out of the recurrence: one
        # (T*B, E) x (E, 4H) bf16 MXU matmul (f32 accumulate), bias folded in.
        # Staged to VMEM scratch so the unrolled loop loads one (B, 4H) tile per
        # step instead of keeping the whole array live in vregs.
        xp_ref[...] = (
            jnp.dot(x_ref[...], w_ih[0], preferred_element_type=jnp.float32)
            + bias[0]
        )

        def cell(gates, c_prev):
            # Activate the FULL (B, 4H) vreg on the EUP first (EUP slot ~free),
            # slice per-gate lanes only afterwards -> no sub-128-lane extract on
            # the pre-activation critical path.
            sig = jax.nn.sigmoid(gates)
            tnh = jnp.tanh(gates)
            i_g = sig[:, 0 * H:1 * H]
            f_g = sig[:, 1 * H:2 * H]
            g_g = tnh[:, 2 * H:3 * H]
            o_g = sig[:, 3 * H:4 * H]
            c_new = f_g * c_prev + i_g * g_g      # elementwise kept f32 (v5e-safe)
            h_new = o_g * jnp.tanh(c_new)
            return h_new, c_new

        h = [jnp.zeros((B, H), jnp.float32) for _ in range(num_layers)]
        c = [jnp.zeros((B, H), jnp.float32) for _ in range(num_layers)]

        # Layer/time wavefront: at wavefront step s, layer l computes t = s - l.
        # All active layers at a step depend only on the previous step's states,
        # so their (tiny) matmuls are independent and overlap in the MXU pipe.
        # Dependent-cell critical path: T + L - 1 instead of T * L.
        # TODO(synk): for long sequences switch this static unroll to
        # lax.fori_loop (carried h/c) to bound trace/compile time.
        for s in range(T + num_layers - 1):
            h_in = list(h)                        # snapshot of previous wavefront
            for l in range(num_layers):
                t = s - l
                if 0 <= t < T:
                    # TODO(synk): hold w_hh resident in MXU weight registers via
                    # pltpu.matmul_push_rhs / matmul_acc_lhs / matmul_pop to skip
                    # re-pushing the RHS every step; kept as jnp.dot for
                    # portability across v5e/v6e/v7x.
                    rec = jnp.dot(h_in[l].astype(jnp.bfloat16), w_hh[l],
                                  preferred_element_type=jnp.float32)
                    if l == 0:
                        gates = xp_ref[pl.ds(t * B, B), :] + rec
                    else:
                        gates = (
                            jnp.dot(h_in[l - 1].astype(jnp.bfloat16), w_ih[l],
                                    preferred_element_type=jnp.float32)
                            + rec + bias[l]
                        )
                    h[l], c[l] = cell(gates, c[l])

        # Classifier head on the last hidden state only; output is a lane-dense
        # (B, C_pad=128) slab -> unmasked full-vreg store.
        o_ref[...] = (
            jnp.dot(h[num_layers - 1].astype(jnp.bfloat16), lin_w_ref[...],
                    preferred_element_type=jnp.float32)
            + lin_b_ref[...]
        )

    return kernel


# ----------------------------------------------------------------------------
# Wrapper
# ----------------------------------------------------------------------------
def lstm_sentiment_forward(tokens, params):
    """tokens: (B, T) int32.  Returns logits (B, num_classes)."""
    # Embedding lookup (gather) -- plain JAX glue outside the kernel.
    x = jnp.take(params["embedding"], tokens.astype(jnp.int32), axis=0)  # (B,T,E)
    B, T, E = x.shape
    H = params["lstm"][0]["w_hh"].shape[1]
    L = len(params["lstm"])
    C = params["linear_w"].shape[0]

    # Pad batch to a full sublane group (>= 8 rows): same per-step latency,
    # 4x better vreg/MXU-row occupancy; padded rows are sliced off at the end.
    B_pad = ((B + 7) // 8) * 8
    # Pad classifier width to a full 128-lane vreg -> unmasked output store.
    C_pad = ((C + 127) // 128) * 128

    x = jnp.transpose(x, (1, 0, 2)).astype(jnp.float32)                  # (T,B,E)
    x = jnp.pad(x, ((0, 0), (0, B_pad - B), (0, 0)))
    x = x.reshape(T * B_pad, E).astype(jnp.bfloat16)

    # Pre-transpose weights in JAX (once, outside the kernel); bf16 operands for
    # the MXU (f32 accumulate in-kernel); biases stay f32 so all gate/elementwise
    # math is f32 (v5e VPU/EUP have no bf16 path).
    kernel_args = [x]
    for layer in params["lstm"]:
        w_ih_t = layer["w_ih"].T.astype(jnp.bfloat16)                    # (D_in, 4H)
        w_hh_t = layer["w_hh"].T.astype(jnp.bfloat16)                    # (H, 4H)
        b = (layer["b_ih"] + layer["b_hh"]).reshape(1, 4 * H).astype(jnp.float32)
        kernel_args += [w_ih_t, w_hh_t, b]

    lin_w_t = params["linear_w"].T.astype(jnp.float32)                   # (H, C)
    lin_w_t = jnp.pad(lin_w_t, ((0, 0), (0, C_pad - C))).astype(jnp.bfloat16)
    lin_b = jnp.pad(params["linear_b"].astype(jnp.float32),
                    (0, C_pad - C)).reshape(1, C_pad)
    kernel_args += [lin_w_t, lin_b]

    # TODO(synk): nn.LSTM inter-layer dropout and self.dropout(x) are no-ops in
    # this forward (dropout result discarded / inference semantics) -> omitted.
    # TODO(synk): on v7x, add a batch (or sequence-group) grid axis with
    # compiler_params=pltpu.CompilerParams(dimension_semantics=("parallel",)) so
    # both TensorCores are used, and switch to tiled BlockSpecs + vmem_limit_bytes
    # once H/T grow past the scoped-VMEM limit (64 MiB physical on v7x).

    kernel = make_fused_lstm_kernel(T, B_pad, H, L)
    out = pl.pallas_call(
        kernel,
        out_shape=jax.ShapeDtypeStruct((B_pad, C_pad), jnp.float32),
        in_specs=[_VMEM_SPEC] * len(kernel_args),
        out_specs=_VMEM_SPEC,
        scratch_shapes=[pltpu.VMEM((T * B_pad, 4 * H), jnp.float32)],
    )(*kernel_args)
    return out[:B, :C]


# ----------------------------------------------------------------------------
# Deterministic parameter init (PyTorch-shaped)
# ----------------------------------------------------------------------------
def init_params(key, config):
    E = config["embedding_dim"]
    H = config["hidden_dim"]
    L = config["num_layers"]
    C = config["num_classes"]
    V = config["num_embeddings"] + 2

    keys = jax.random.split(key, 2 + 4 * L + 2)
    k_iter = iter(keys)

    params = {}
    params["embedding"] = jax.random.normal(next(k_iter), (V, E), jnp.float32)

    bound = 1.0 / math.sqrt(H)
    lstm_layers = []
    for layer in range(L):
        d_in = E if layer == 0 else H
        lstm_layers.append(
            {
                "w_ih": jax.random.uniform(next(k_iter), (4 * H, d_in), jnp.float32, -bound, bound),
                "w_hh": jax.random.uniform(next(k_iter), (4 * H, H), jnp.float32, -bound, bound),
                "b_ih": jax.random.uniform(next(k_iter), (4 * H,), jnp.float32, -bound, bound),
                "b_hh": jax.random.uniform(next(k_iter), (4 * H,), jnp.float32, -bound, bound),
            }
        )
    params["lstm"] = lstm_layers

    lb = 1.0 / math.sqrt(H)
    params["linear_w"] = jax.random.uniform(next(k_iter), (C, H), jnp.float32, -lb, lb)
    params["linear_b"] = jax.random.uniform(next(k_iter), (C,), jnp.float32, -lb, lb)
    return params


# ----------------------------------------------------------------------------
# Pure-JAX reference (PyTorch gate order i,f,g,o).  matmul_dtype=bf16 matches the
# kernel's mixed precision exactly; matmul_dtype=f32 is the full-precision model.
# ----------------------------------------------------------------------------
def reference_forward(tokens, params, H, matmul_dtype=jnp.float32):
    x = jnp.take(params["embedding"], tokens.astype(jnp.int32), axis=0).astype(jnp.float32)
    B = x.shape[0]
    for layer in params["lstm"]:
        w_ih = layer["w_ih"].astype(matmul_dtype)
        w_hh = layer["w_hh"].astype(matmul_dtype)
        b = (layer["b_ih"] + layer["b_hh"]).astype(jnp.float32)

        def cell(carry, x_t, w_ih=w_ih, w_hh=w_hh, b=b):
            h, c = carry
            g = (jnp.dot(x_t.astype(matmul_dtype), w_ih.T, preferred_element_type=jnp.float32)
                 + jnp.dot(h.astype(matmul_dtype), w_hh.T, preferred_element_type=jnp.float32)
                 + b)
            i = jax.nn.sigmoid(g[:, 0 * H:1 * H])
            f = jax.nn.sigmoid(g[:, 1 * H:2 * H])
            gg = jnp.tanh(g[:, 2 * H:3 * H])
            o = jax.nn.sigmoid(g[:, 3 * H:4 * H])
            c = f * c + i * gg
            h = o * jnp.tanh(c)
            return (h, c), h

        init = (jnp.zeros((B, H), jnp.float32), jnp.zeros((B, H), jnp.float32))
        _, ys = jax.lax.scan(cell, init, jnp.transpose(x, (1, 0, 2)))
        x = jnp.transpose(ys, (1, 0, 2))
    lw = params["linear_w"].astype(matmul_dtype)
    return (jnp.dot(x[:, -1, :].astype(matmul_dtype), lw.T,
                    preferred_element_type=jnp.float32)
            + params["linear_b"].astype(jnp.float32))


# ----------------------------------------------------------------------------
if __name__ == "__main__":
    config = {
        "num_embeddings": 50,
        "embedding_dim": 32,
        "hidden_dim": 32,
        "num_layers": 2,
        "num_classes": 4,
        "dropout": 0.0,
    }
    B, T = 2, 8

    key = jax.random.PRNGKey(0)
    k_tok, k_par = jax.random.split(key)
    tokens = jax.random.randint(k_tok, (B, T), 0, config["num_embeddings"] + 2, jnp.int32)
    params = init_params(k_par, config)

    logits = lstm_sentiment_forward(tokens, params)
    logits = jax.block_until_ready(logits)

    H = config["hidden_dim"]
    # 1) Kernel implements the math exactly: compare against a reference that
    #    uses the same bf16 matmul operands / f32 accumulation.
    ref_mixed = reference_forward(tokens, params, H, matmul_dtype=jnp.bfloat16)
    np.testing.assert_allclose(np.asarray(logits), np.asarray(ref_mixed),
                               rtol=1e-3, atol=1e-3)
    # 2) bf16-operand quantization error vs the full-f32 reference (tolerance
    #    loosened per perf review -- bf16 MXU operands are intentional).
    ref_f32 = reference_forward(tokens, params, H, matmul_dtype=jnp.float32)
    np.testing.assert_allclose(np.asarray(logits), np.asarray(ref_f32),
                               rtol=5e-2, atol=5e-2)

    print("KERNEL_OK")
</pallas_src>

<mosaic_0001>
module attributes {stable_mosaic.version = 11 : i64} {
  func.func @kernel(%arg0: memref<64x32xbf16, #tpu.memory_space<vmem>>, %arg1: memref<32x128xbf16, #tpu.memory_space<vmem>>, %arg2: memref<32x128xbf16, #tpu.memory_space<vmem>>, %arg3: memref<1x128xf32, #tpu.memory_space<vmem>>, %arg4: memref<32x128xbf16, #tpu.memory_space<vmem>>, %arg5: memref<32x128xbf16, #tpu.memory_space<vmem>>, %arg6: memref<1x128xf32, #tpu.memory_space<vmem>>, %arg7: memref<32x128xbf16, #tpu.memory_space<vmem>>, %arg8: memref<1x128xf32, #tpu.memory_space<vmem>>, %arg9: memref<8x128xf32, #tpu.memory_space<vmem>>, %arg10: memref<64x128xf32, #tpu.memory_space<vmem>>) attributes {dimension_semantics = [], scalar_prefetch = 0 : i64, scratch_operands = 1 : i64, tpu.core_type = #tpu.core_type<tc>} {
    %c0 = arith.constant 0 : index
    %c0_0 = arith.constant 0 : index
    %0 = vector.load %arg1[%c0, %c0_0] : memref<32x128xbf16, #tpu.memory_space<vmem>>, vector<32x128xbf16>
    %c0_1 = arith.constant 0 : index
    %c0_2 = arith.constant 0 : index
    %1 = vector.load %arg4[%c0_1, %c0_2] : memref<32x128xbf16, #tpu.memory_space<vmem>>, vector<32x128xbf16>
    %c0_3 = arith.constant 0 : index
    %c0_4 = arith.constant 0 : index
    %2 = vector.load %arg2[%c0_3, %c0_4] : memref<32x128xbf16, #tpu.memory_space<vmem>>, vector<32x128xbf16>
    %c0_5 = arith.constant 0 : index
    %c0_6 = arith.constant 0 : index
    %3 = vector.load %arg5[%c0_5, %c0_6] : memref<32x128xbf16, #tpu.memory_space<vmem>>, vector<32x128xbf16>
    %c0_7 = arith.constant 0 : index
    %c0_8 = arith.constant 0 : index
    %4 = vector.load %arg3[%c0_7, %c0_8] : memref<1x128xf32, #tpu.memory_space<vmem>>, vector<1x128xf32>
    %c0_9 = arith.constant 0 : index
    %c0_10 = arith.constant 0 : index
    %5 = vector.load %arg6[%c0_9, %c0_10] : memref<1x128xf32, #tpu.memory_space<vmem>>, vector<1x128xf32>
    %c0_11 = arith.constant 0 : index
    %c0_12 = arith.constant 0 : index
    %6 = vector.load %arg0[%c0_11, %c0_12] : memref<64x32xbf16, #tpu.memory_space<vmem>>, vector<64x32xbf16>
    %cst = arith.constant dense<0.000000e+00> : vector<64x128xf32>
    %7 = tpu.matmul %6, %0, %cst {dimension_numbers = #tpu.dot_dimension_numbers<[1], [0], [0], [1], [0, 0, 1, 1], [], []>} : vector<64x32xbf16>, vector<32x128xbf16>, vector<64x128xf32> -> vector<64x128xf32>
    %8 = vector.broadcast %4 : vector<1x128xf32> to vector<64x128xf32>
    %9 = arith.addf %7, %8 : vector<64x128xf32>
    %c0_13 = arith.constant 0 : index
    %c0_14 = arith.constant 0 : index
    %10 = vector.load %arg10[%c0_13, %c0_14] : memref<64x128xf32, #tpu.memory_space<vmem>>, vector<64x128xf32>
    tpu.vector_store %arg10[%c0_13, %c0_14], %9 {strides = array<i32>} : memref<64x128xf32, #tpu.memory_space<vmem>>, vector<64x128xf32>,
    %cst_15 = arith.constant 0.000000e+00 : f32
    %11 = vector.broadcast %cst_15 : f32 to vector<8x32xf32>
    %cst_16 = arith.constant 0.000000e+00 : f32
    %12 = vector.broadcast %cst_16 : f32 to vector<8x32xf32>
    %cst_17 = arith.constant 0.000000e+00 : f32
    %13 = vector.broadcast %cst_17 : f32 to vector<8x32xf32>
    %cst_18 = arith.constant 0.000000e+00 : f32
    %14 = vector.broadcast %cst_18 : f32 to vector<8x32xf32>
    %15 = arith.truncf %11 : vector<8x32xf32> to vector<8x32xbf16>
    %cst_19 = arith.constant dense<0.000000e+00> : vector<8x128xf32>
    %16 = tpu.matmul %15, %2, %cst_19 {dimension_numbers = #tpu.dot_dimension_numbers<[1], [0], [0], [1], [0, 0, 1, 1], [], []>} : vector<8x32xbf16>, vector<32x128xbf16>, vector<8x128xf32> -> vector<8x128xf32>
    %c0_20 = arith.constant 0 : index
    %c0_21 = arith.constant 0 : index
    %17 = vector.load %arg10[%c0_20, %c0_21] : memref<64x128xf32, #tpu.memory_space<vmem>>, vector<8x128xf32>
    %18 = arith.addf %17, %16 : vector<8x128xf32>
    %19 = arith.negf %18 : vector<8x128xf32>
    %20 = math.exp %19 : vector<8x128xf32>
    %cst_22 = arith.constant 1.000000e+00 : f32
    %21 = vector.broadcast %cst_22 : f32 to vector<8x128xf32>
    %22 = arith.addf %21, %20 : vector<8x128xf32>
    %23 = arith.divf %21, %22 : vector<8x128xf32>
    %24 = math.tanh %18 : vector<8x128xf32>
    %25 = vector.extract_strided_slice %23 {offsets = [0, 0], sizes = [8, 32], strides = [1, 1]} : vector<8x128xf32> to vector<8x32xf32>
    %26 = vector.extract_strided_slice %23 {offsets = [0, 32], sizes = [8, 32], strides = [1, 1]} : vector<8x128xf32> to vector<8x32xf32>
    %27 = vector.extract_strided_slice %24 {offsets = [0, 64], sizes = [8, 32], strides = [1, 1]} : vector<8x128xf32> to vector<8x32xf32>
    %28 = vector.extract_strided_slice %23 {offsets = [0, 96], sizes = [8, 32], strides = [1, 1]} : vector<8x128xf32> to vector<8x32xf32>
    %29 = arith.mulf %26, %13 : vector<8x32xf32>
    %30 = arith.mulf %25, %27 : vector<8x32xf32>
    %31 = arith.addf %29, %30 : vector<8x32xf32>
    %32 = math.tanh %31 : vector<8x32xf32>
    %33 = arith.mulf %28, %32 : vector<8x32xf32>
    %34 = arith.truncf %33 : vector<8x32xf32> to vector<8x32xbf16>
    %cst_23 = arith.constant dense<0.000000e+00> : vector<8x128xf32>
    %35 = tpu.matmul %34, %2, %cst_23 {dimension_numbers = #tpu.dot_dimension_numbers<[1], [0], [0], [1], [0, 0, 1, 1], [], []>} : vector<8x32xbf16>, vector<32x128xbf16>, vector<8x128xf32> -> vector<8x128xf32>
    %c8 = arith.constant 8 : index
    %c0_24 = arith.constant 0 : index
    %36 = vector.load %arg10[%c8, %c0_24] : memref<64x128xf32, #tpu.memory_space<vmem>>, vector<8x128xf32>
    %37 = arith.addf %36, %35 : vector<8x128xf32>
    %38 = arith.negf %37 : vector<8x128xf32>
    %39 = math.exp %38 : vector<8x128xf32>
    %cst_25 = arith.constant 1.000000e+00 : f32
    %40 = vector.broadcast %cst_25 : f32 to vector<8x128xf32>
    %41 = arith.addf %40, %39 : vector<8x128xf32>
    %42 = arith.divf %40, %41 : vector<8x128xf32>
    %43 = math.tanh %37 : vector<8x128xf32>
    %44 = vector.extract_strided_slice %42 {offsets = [0, 0], sizes = [8, 32], strides = [1, 1]} : vector<8x128xf32> to vector<8x32xf32>
    %45 = vector.extract_strided_slice %42 {offsets = [0, 32], sizes = [8, 32], strides = [1, 1]} : vector<8x128xf32> to vector<8x32xf32>
    %46 = vector.extract_strided_slice %43 {offsets = [0, 64], sizes = [8, 32], strides = [1, 1]} : vector<8x128xf32> to vector<8x32xf32>
    %47 = vector.extract_strided_slice %42 {offsets = [0, 96], sizes = [8, 32], strides = [1, 1]} : vector<8x128xf32> to vector<8x32xf32>
    %48 = arith.mulf %45, %31 : vector<8x32xf32>
    %49 = arith.mulf %44, %46 : vector<8x32xf32>
    %50 = arith.addf %48, %49 : vector<8x32xf32>
    %51 = math.tanh %50 : vector<8x32xf32>
    %52 = arith.mulf %47, %51 : vector<8x32xf32>
    %53 = arith.truncf %12 : vector<8x32xf32> to vector<8x32xbf16>
    %cst_26 = arith.constant dense<0.000000e+00> : vector<8x128xf32>
    %54 = tpu.matmul %53, %3, %cst_26 {dimension_numbers = #tpu.dot_dimension_numbers<[1], [0], [0], [1], [0, 0, 1, 1], [], []>} : vector<8x32xbf16>, vector<32x128xbf16>, vector<8x128xf32> -> vector<8x128xf32>
    %55 = arith.truncf %33 : vector<8x32xf32> to vector<8x32xbf16>
    %cst_27 = arith.constant dense<0.000000e+00> : vector<8x128xf32>
    %56 = tpu.matmul %55, %1, %cst_27 {dimension_numbers = #tpu.dot_dimension_numbers<[1], [0], [0], [1], [0, 0, 1, 1], [], []>} : vector<8x32xbf16>, vector<32x128xbf16>, vector<8x128xf32> -> vector<8x128xf32>
    %57 = arith.addf %56, %54 : vector<8x128xf32>
    %58 = vector.broadcast %5 : vector<1x128xf32> to vector<8x128xf32>
    %59 = arith.addf %57, %58 : vector<8x128xf32>
    %60 = arith.negf %59 : vector<8x128xf32>
    %61 = math.exp %60 : vector<8x128xf32>
    %cst_28 = arith.constant 1.000000e+00 : f32
    %62 = vector.broadcast %cst_28 : f32 to vector<8x128xf32>
    %63 = arith.addf %62, %61 : vector<8x128xf32>
    %64 = arith.divf %62, %63 : vector<8x128xf32>
    %65 = math.tanh %59 : vector<8x128xf32>
    %66 = vector.extract_strided_slice %64 {offsets = [0, 0], sizes = [8, 32], strides = [1, 1]} : vector<8x128xf32> to vector<8x32xf32>
    %67 = vector.extract_strided_slice %64 {offsets = [0, 32], sizes = [8, 32], strides = [1, 1]} : vector<8x128xf32> to vector<8x32xf32>
    %68 = vector.extract_strided_slice %65 {offsets = [0, 64], sizes = [8, 32], strides = [1, 1]} : vector<8x128xf32> to vector<8x32xf32>
    %69 = vector.extract_strided_slice %64 {offsets = [0, 96], sizes = [8, 32], strides = [1, 1]} : vector<8x128xf32> to vector<8x32xf32>
    %70 = arith.mulf %67, %14 : vector<8x32xf32>
    %71 = arith.mulf %66, %68 : vector<8x32xf32>
    %72 = arith.addf %70, %71 : vector<8x32xf32>
    %73 = math.tanh %72 : vector<8x32xf32>
    %74 = arith.mulf %69, %73 : vector<8x32xf32>
    %75 = arith.truncf %52 : vector<8x32xf32> to vector<8x32xbf16>
    %cst_29 = arith.constant dense<0.000000e+00> : vector<8x128xf32>
    %76 = tpu.matmul %75, %2, %cst_29 {dimension_numbers = #tpu.dot_dimension_numbers<[1], [0], [0], [1], [0, 0, 1, 1], [], []>} : vector<8x32xbf16>, vector<32x128xbf16>, vector<8x128xf32> -> vector<8x128xf32>
    %c16 = arith.constant 16 : index
    %c0_30 = arith.constant 0 : index
    %77 = vector.load %arg10[%c16, %c0_30] : memref<64x128xf32, #tpu.memory_space<vmem>>, vector<8x128xf32>
    %78 = arith.addf %77, %76 : vector<8x128xf32>
    %79 = arith.negf %78 : vector<8x128xf32>
    %80 = math.exp %79 : vector<8x128xf32>
    %cst_31 = arith.constant 1.000000e+00 : f32
    %81 = vector.broadcast %cst_31 : f32 to vector<8x128xf32>
    %82 = arith.addf %81, %80 : vector<8x128xf32>
    %83 = arith.divf %81, %82 : vector<8x128xf32>
    %84 = math.tanh %78 : vector<8x128xf32>
    %85 = vector.extract_strided_slice %83 {offsets = [0, 0], sizes = [8, 32], strides = [1, 1]} : vector<8x128xf32> to vector<8x32xf32>
    %86 = vector.extract_strided_slice %83 {offsets = [0, 32], sizes = [8, 32], strides = [1, 1]} : vector<8x128xf32> to vector<8x32xf32>
    %87 = vector.extract_strided_slice %84 {offsets = [0, 64], sizes = [8, 32], strides = [1, 1]} : vector<8x128xf32> to vector<8x32xf32>
    %88 = vector.extract_strided_slice %83 {offsets = [0, 96], sizes = [8, 32], strides = [1, 1]} : vector<8x128xf32> to vector<8x32xf32>
    %89 = arith.mulf %86, %50 : vector<8x32xf32>
    %90 = arith.mulf %85, %87 : vector<8x32xf32>
    %91 = arith.addf %89, %90 : vector<8x32xf32>
    %92 = math.tanh %91 : vector<8x32xf32>
    %93 = arith.mulf %88, %92 : vector<8x32xf32>
    %94 = arith.truncf %74 : vector<8x32xf32> to vector<8x32xbf16>
    %cst_32 = arith.constant dense<0.000000e+00> : vector<8x128xf32>
    %95 = tpu.matmul %94, %3, %cst_32 {dimension_numbers = #tpu.dot_dimension_numbers<[1], [0], [0], [1], [0, 0, 1, 1], [], []>} : vector<8x32xbf16>, vector<32x128xbf16>, vector<8x128xf32> -> vector<8x128xf32>
    %96 = arith.truncf %52 : vector<8x32xf32> to vector<8x32xbf16>
    %cst_33 = arith.constant dense<0.000000e+00> : vector<8x128xf32>
    %97 = tpu.matmul %96, %1, %cst_33 {dimension_numbers = #tpu.dot_dimension_numbers<[1], [0], [0], [1], [0, 0, 1, 1], [], []>} : vector<8x32xbf16>, vector<32x128xbf16>, vector<8x128xf32> -> vector<8x128xf32>
    %98 = arith.addf %97, %95 : vector<8x128xf32>
    %99 = vector.broadcast %5 : vector<1x128xf32> to vector<8x128xf32>
    %100 = arith.addf %98, %99 : vector<8x128xf32>
    %101 = arith.negf %100 : vector<8x128xf32>
    %102 = math.exp %101 : vector<8x128xf32>
    %cst_34 = arith.constant 1.000000e+00 : f32
    %103 = vector.broadcast %cst_34 : f32 to vector<8x128xf32>
    %104 = arith.addf %103, %102 : vector<8x128xf32>
    %105 = arith.divf %103, %104 : vector<8x128xf32>
    %106 = math.tanh %100 : vector<8x128xf32>
    %107 = vector.extract_strided_slice %105 {offsets = [0, 0], sizes = [8, 32], strides = [1, 1]} : vector<8x128xf32> to vector<8x32xf32>
    %108 = vector.extract_strided_slice %105 {offsets = [0, 32], sizes = [8, 32], strides = [1, 1]} : vector<8x128xf32> to vector<8x32xf32>
    %109 = vector.extract_strided_slice %106 {offsets = [0, 64], sizes = [8, 32], strides = [1, 1]} : vector<8x128xf32> to vector<8x32xf32>
    %110 = vector.extract_strided_slice %105 {offsets = [0, 96], sizes = [8, 32], strides = [1, 1]} : vector<8x128xf32> to vector<8x32xf32>
    %111 = arith.mulf %108, %72 : vector<8x32xf32>
    %112 = arith.mulf %107, %109 : vector<8x32xf32>
    %113 = arith.addf %111, %112 : vector<8x32xf32>
    %114 = math.tanh %113 : vector<8x32xf32>
    %115 = arith.mulf %110, %114 : vector<8x32xf32>
    %116 = arith.truncf %93 : vector<8x32xf32> to vector<8x32xbf16>
    %cst_35 = arith.constant dense<0.000000e+00> : vector<8x128xf32>
    %117 = tpu.matmul %116, %2, %cst_35 {dimension_numbers = #tpu.dot_dimension_numbers<[1], [0], [0], [1], [0, 0, 1, 1], [], []>} : vector<8x32xbf16>, vector<32x128xbf16>, vector<8x128xf32> -> vector<8x128xf32>
    %c24 = arith.constant 24 : index
    %c0_36 = arith.constant 0 : index
    %118 = vector.load %arg10[%c24, %c0_36] : memref<64x128xf32, #tpu.memory_space<vmem>>, vector<8x128xf32>
    %119 = arith.addf %118, %117 : vector<8x128xf32>
    %120 = arith.negf %119 : vector<8x128xf32>
    %121 = math.exp %120 : vector<8x128xf32>
    %cst_37 = arith.constant 1.000000e+00 : f32
    %122 = vector.broadcast %cst_37 : f32 to vector<8x128xf32>
    %123 = arith.addf %122, %121 : vector<8x128xf32>
    %124 = arith.divf %122, %123 : vector<8x128xf32>
    %125 = math.tanh %119 : vector<8x128xf32>
    %126 = vector.extract_strided_slice %124 {offsets = [0, 0], sizes = [8, 32], strides = [1, 1]} : vector<8x128xf32> to vector<8x32xf32>
    %127 = vector.extract_strided_slice %124 {offsets = [0, 32], sizes = [8, 32], strides = [1, 1]} : vector<8x128xf32> to vector<8x32xf32>
    %128 = vector.extract_strided_slice %125 {offsets = [0, 64], sizes = [8, 32], strides = [1, 1]} : vector<8x128xf32> to vector<8x32xf32>
    %129 = vector.extract_strided_slice %124 {offsets = [0, 96], sizes = [8, 32], strides = [1, 1]} : vector<8x128xf32> to vector<8x32xf32>
    %130 = arith.mulf %127, %91 : vector<8x32xf32>
    %131 = arith.mulf %126, %128 : vector<8x32xf32>
    %132 = arith.addf %130, %131 : vector<8x32xf32>
    %133 = math.tanh %132 : vector<8x32xf32>
    %134 = arith.mulf %129, %133 : vector<8x32xf32>
    %135 = arith.truncf %115 : vector<8x32xf32> to vector<8x32xbf16>
    %cst_38 = arith.constant dense<0.000000e+00> : vector<8x128xf32>
    %136 = tpu.matmul %135, %3, %cst_38 {dimension_numbers = #tpu.dot_dimension_numbers<[1], [0], [0], [1], [0, 0, 1, 1], [], []>} : vector<8x32xbf16>, vector<32x128xbf16>, vector<8x128xf32> -> vector<8x128xf32>
    %137 = arith.truncf %93 : vector<8x32xf32> to vector<8x32xbf16>
    %cst_39 = arith.constant dense<0.000000e+00> : vector<8x128xf32>
    %138 = tpu.matmul %137, %1, %cst_39 {dimension_numbers = #tpu.dot_dimension_numbers<[1], [0], [0], [1], [0, 0, 1, 1], [], []>} : vector<8x32xbf16>, vector<32x128xbf16>, vector<8x128xf32> -> vector<8x128xf32>
    %139 = arith.addf %138, %136 : vector<8x128xf32>
    %140 = vector.broadcast %5 : vector<1x128xf32> to vector<8x128xf32>
    %141 = arith.addf %139, %140 : vector<8x128xf32>
    %142 = arith.negf %141 : vector<8x128xf32>
    %143 = math.exp %142 : vector<8x128xf32>
    %cst_40 = arith.constant 1.000000e+00 : f32
    %144 = vector.broadcast %cst_40 : f32 to vector<8x128xf32>
    %145 = arith.addf %144, %143 : vector<8x128xf32>
    %146 = arith.divf %144, %145 : vector<8x128xf32>
    %147 = math.tanh %141 : vector<8x128xf32>
    %148 = vector.extract_strided_slice %146 {offsets = [0, 0], sizes = [8, 32], strides = [1, 1]} : vector<8x128xf32> to vector<8x32xf32>
    %149 = vector.extract_strided_slice %146 {offsets = [0, 32], sizes = [8, 32], strides = [1, 1]} : vector<8x128xf32> to vector<8x32xf32>
    %150 = vector.extract_strided_slice %147 {offsets = [0, 64], sizes = [8, 32], strides = [1, 1]} : vector<8x128xf32> to vector<8x32xf32>
    %151 = vector.extract_strided_slice %146 {offsets = [0, 96], sizes = [8, 32], strides = [1, 1]} : vector<8x128xf32> to vector<8x32xf32>
    %152 = arith.mulf %149, %113 : vector<8x32xf32>
    %153 = arith.mulf %148, %150 : vector<8x32xf32>
    %154 = arith.addf %152, %153 : vector<8x32xf32>
    %155 = math.tanh %154 : vector<8x32xf32>
    %156 = arith.mulf %151, %155 : vector<8x32xf32>
    %157 = arith.truncf %134 : vector<8x32xf32> to vector<8x32xbf16>
    %cst_41 = arith.constant dense<0.000000e+00> : vector<8x128xf32>
    %158 = tpu.matmul %157, %2, %cst_41 {dimension_numbers = #tpu.dot_dimension_numbers<[1], [0], [0], [1], [0, 0, 1, 1], [], []>} : vector<8x32xbf16>, vector<32x128xbf16>, vector<8x128xf32> -> vector<8x128xf32>
    %c32 = arith.constant 32 : index
    %c0_42 = arith.constant 0 : index
    %159 = vector.load %arg10[%c32, %c0_42] : memref<64x128xf32, #tpu.memory_space<vmem>>, vector<8x128xf32>
    %160 = arith.addf %159, %158 : vector<8x128xf32>
    %161 = arith.negf %160 : vector<8x128xf32>
    %162 = math.exp %161 : vector<8x128xf32>
    %cst_43 = arith.constant 1.000000e+00 : f32
    %163 = vector.broadcast %cst_43 : f32 to vector<8x128xf32>
    %164 = arith.addf %163, %162 : vector<8x128xf32>
    %165 = arith.divf %163, %164 : vector<8x128xf32>
    %166 = math.tanh %160 : vector<8x128xf32>
    %167 = vector.extract_strided_slice %165 {offsets = [0, 0], sizes = [8, 32], strides = [1, 1]} : vector<8x128xf32> to vector<8x32xf32>
    %168 = vector.extract_strided_slice %165 {offsets = [0, 32], sizes = [8, 32], strides = [1, 1]} : vector<8x128xf32> to vector<8x32xf32>
    %169 = vector.extract_strided_slice %166 {offsets = [0, 64], sizes = [8, 32], strides = [1, 1]} : vector<8x128xf32> to vector<8x32xf32>
    %170 = vector.extract_strided_slice %165 {offsets = [0, 96], sizes = [8, 32], strides = [1, 1]} : vector<8x128xf32> to vector<8x32xf32>
    %171 = arith.mulf %168, %132 : vector<8x32xf32>
    %172 = arith.mulf %167, %169 : vector<8x32xf32>
    %173 = arith.addf %171, %172 : vector<8x32xf32>
    %174 = math.tanh %173 : vector<8x32xf32>
    %175 = arith.mulf %170, %174 : vector<8x32xf32>
    %176 = arith.truncf %156 : vector<8x32xf32> to vector<8x32xbf16>
    %cst_44 = arith.constant dense<0.000000e+00> : vector<8x128xf32>
    %177 = tpu.matmul %176, %3, %cst_44 {dimension_numbers = #tpu.dot_dimension_numbers<[1], [0], [0], [1], [0, 0, 1, 1], [], []>} : vector<8x32xbf16>, vector<32x128xbf16>, vector<8x128xf32> -> vector<8x128xf32>
    %178 = arith.truncf %134 : vector<8x32xf32> to vector<8x32xbf16>
    %cst_45 = arith.constant dense<0.000000e+00> : vector<8x128xf32>
    %179 = tpu.matmul %178, %1, %cst_45 {dimension_numbers = #tpu.dot_dimension_numbers<[1], [0], [0], [1], [0, 0, 1, 1], [], []>} : vector<8x32xbf16>, vector<32x128xbf16>, vector<8x128xf32> -> vector<8x128xf32>
    %180 = arith.addf %179, %177 : vector<8x128xf32>
    %181 = vector.broadcast %5 : vector<1x128xf32> to vector<8x128xf32>
    %182 = arith.addf %180, %181 : vector<8x128xf32>
    %183 = arith.negf %182 : vector<8x128xf32>
    %184 = math.exp %183 : vector<8x128xf32>
    %cst_46 = arith.constant 1.000000e+00 : f32
    %185 = vector.broadcast %cst_46 : f32 to vector<8x128xf32>
    %186 = arith.addf %185, %184 : vector<8x128xf32>
    %187 = arith.divf %185, %186 : vector<8x128xf32>
    %188 = math.tanh %182 : vector<8x128xf32>
    %189 = vector.extract_strided_slice %187 {offsets = [0, 0], sizes = [8, 32], strides = [1, 1]} : vector<8x128xf32> to vector<8x32xf32>
    %190 = vector.extract_strided_slice %187 {offsets = [0, 32], sizes = [8, 32], strides = [1, 1]} : vector<8x128xf32> to vector<8x32xf32>
    %191 = vector.extract_strided_slice %188 {offsets = [0, 64], sizes = [8, 32], strides = [1, 1]} : vector<8x128xf32> to vector<8x32xf32>
    %192 = vector.extract_strided_slice %187 {offsets = [0, 96], sizes = [8, 32], strides = [1, 1]} : vector<8x128xf32> to vector<8x32xf32>
    %193 = arith.mulf %190, %154 : vector<8x32xf32>
    %194 = arith.mulf %189, %191 : vector<8x32xf32>
    %195 = arith.addf %193, %194 : vector<8x32xf32>
    %196 = math.tanh %195 : vector<8x32xf32>
    %197 = arith.mulf %192, %196 : vector<8x32xf32>
    %198 = arith.truncf %175 : vector<8x32xf32> to vector<8x32xbf16>
    %cst_47 = arith.constant dense<0.000000e+00> : vector<8x128xf32>
    %199 = tpu.matmul %198, %2, %cst_47 {dimension_numbers = #tpu.dot_dimension_numbers<[1], [0], [0], [1], [0, 0, 1, 1], [], []>} : vector<8x32xbf16>, vector<32x128xbf16>, vector<8x128xf32> -> vector<8x128xf32>
    %c40 = arith.constant 40 : index
    %c0_48 = arith.constant 0 : index
    %200 = vector.load %arg10[%c40, %c0_48] : memref<64x128xf32, #tpu.memory_space<vmem>>, vector<8x128xf32>
    %201 = arith.addf %200, %199 : vector<8x128xf32>
    %202 = arith.negf %201 : vector<8x128xf32>
    %203 = math.exp %202 : vector<8x128xf32>
    %cst_49 = arith.constant 1.000000e+00 : f32
    %204 = vector.broadcast %cst_49 : f32 to vector<8x128xf32>
    %205 = arith.addf %204, %203 : vector<8x128xf32>
    %206 = arith.divf %204, %205 : vector<8x128xf32>
    %207 = math.tanh %201 : vector<8x128xf32>
    %208 = vector.extract_strided_slice %206 {offsets = [0, 0], sizes = [8, 32], strides = [1, 1]} : vector<8x128xf32> to vector<8x32xf32>
    %209 = vector.extract_strided_slice %206 {offsets = [0, 32], sizes = [8, 32], strides = [1, 1]} : vector<8x128xf32> to vector<8x32xf32>
    %210 = vector.extract_strided_slice %207 {offsets = [0, 64], sizes = [8, 32], strides = [1, 1]} : vector<8x128xf32> to vector<8x32xf32>
    %211 = vector.extract_strided_slice %206 {offsets = [0, 96], sizes = [8, 32], strides = [1, 1]} : vector<8x128xf32> to vector<8x32xf32>
    %212 = arith.mulf %209, %173 : vector<8x32xf32>
    %213 = arith.mulf %208, %210 : vector<8x32xf32>
    %214 = arith.addf %212, %213 : vector<8x32xf32>
    %215 = math.tanh %214 : vector<8x32xf32>
    %216 = arith.mulf %211, %215 : vector<8x32xf32>
    %217 = arith.truncf %197 : vector<8x32xf32> to vector<8x32xbf16>
    %cst_50 = arith.constant dense<0.000000e+00> : vector<8x128xf32>
    %218 = tpu.matmul %217, %3, %cst_50 {dimension_numbers = #tpu.dot_dimension_numbers<[1], [0], [0], [1], [0, 0, 1, 1], [], []>} : vector<8x32xbf16>, vector<32x128xbf16>, vector<8x128xf32> -> vector<8x128xf32>
    %219 = arith.truncf %175 : vector<8x32xf32> to vector<8x32xbf16>
    %cst_51 = arith.constant dense<0.000000e+00> : vector<8x128xf32>
    %220 = tpu.matmul %219, %1, %cst_51 {dimension_numbers = #tpu.dot_dimension_numbers<[1], [0], [0], [1], [0, 0, 1, 1], [], []>} : vector<8x32xbf16>, vector<32x128xbf16>, vector<8x128xf32> -> vector<8x128xf32>
    %221 = arith.addf %220, %218 : vector<8x128xf32>
    %222 = vector.broadcast %5 : vector<1x128xf32> to vector<8x128xf32>
    %223 = arith.addf %221, %222 : vector<8x128xf32>
    %224 = arith.negf %223 : vector<8x128xf32>
    %225 = math.exp %224 : vector<8x128xf32>
    %cst_52 = arith.constant 1.000000e+00 : f32
    %226 = vector.broadcast %cst_52 : f32 to vector<8x128xf32>
    %227 = arith.addf %226, %225 : vector<8x128xf32>
    %228 = arith.divf %226, %227 : vector<8x128xf32>
    %229 = math.tanh %223 : vector<8x128xf32>
    %230 = vector.extract_strided_slice %228 {offsets = [0, 0], sizes = [8, 32], strides = [1, 1]} : vector<8x128xf32> to vector<8x32xf32>
    %231 = vector.extract_strided_slice %228 {offsets = [0, 32], sizes = [8, 32], strides = [1, 1]} : vector<8x128xf32> to vector<8x32xf32>
    %232 = vector.extract_strided_slice %229 {offsets = [0, 64], sizes = [8, 32], strides = [1, 1]} : vector<8x128xf32> to vector<8x32xf32>
    %233 = vector.extract_strided_slice %228 {offsets = [0, 96], sizes = [8, 32], strides = [1, 1]} : vector<8x128xf32> to vector<8x32xf32>
    %234 = arith.mulf %231, %195 : vector<8x32xf32>
    %235 = arith.mulf %230, %232 : vector<8x32xf32>
    %236 = arith.addf %234, %235 : vector<8x32xf32>
    %237 = math.tanh %236 : vector<8x32xf32>
    %238 = arith.mulf %233, %237 : vector<8x32xf32>
    %239 = arith.truncf %216 : vector<8x32xf32> to vector<8x32xbf16>
    %cst_53 = arith.constant dense<0.000000e+00> : vector<8x128xf32>
    %240 = tpu.matmul %239, %2, %cst_53 {dimension_numbers = #tpu.dot_dimension_numbers<[1], [0], [0], [1], [0, 0, 1, 1], [], []>} : vector<8x32xbf16>, vector<32x128xbf16>, vector<8x128xf32> -> vector<8x128xf32>
    %c48 = arith.constant 48 : index
    %c0_54 = arith.constant 0 : index
    %241 = vector.load %arg10[%c48, %c0_54] : memref<64x128xf32, #tpu.memory_space<vmem>>, vector<8x128xf32>
    %242 = arith.addf %241, %240 : vector<8x128xf32>
    %243 = arith.negf %242 : vector<8x128xf32>
    %244 = math.exp %243 : vector<8x128xf32>
    %cst_55 = arith.constant 1.000000e+00 : f32
    %245 = vector.broadcast %cst_55 : f32 to vector<8x128xf32>
    %246 = arith.addf %245, %244 : vector<8x128xf32>
    %247 = arith.divf %245, %246 : vector<8x128xf32>
    %248 = math.tanh %242 : vector<8x128xf32>
    %249 = vector.extract_strided_slice %247 {offsets = [0, 0], sizes = [8, 32], strides = [1, 1]} : vector<8x128xf32> to vector<8x32xf32>
    %250 = vector.extract_strided_slice %247 {offsets = [0, 32], sizes = [8, 32], strides = [1, 1]} : vector<8x128xf32> to vector<8x32xf32>
    %251 = vector.extract_strided_slice %248 {offsets = [0, 64], sizes = [8, 32], strides = [1, 1]} : vector<8x128xf32> to vector<8x32xf32>
    %252 = vector.extract_strided_slice %247 {offsets = [0, 96], sizes = [8, 32], strides = [1, 1]} : vector<8x128xf32> to vector<8x32xf32>
    %253 = arith.mulf %250, %214 : vector<8x32xf32>
    %254 = arith.mulf %249, %251 : vector<8x32xf32>
    %255 = arith.addf %253, %254 : vector<8x32xf32>
    %256 = math.tanh %255 : vector<8x32xf32>
    %257 = arith.mulf %252, %256 : vector<8x32xf32>
    %258 = arith.truncf %238 : vector<8x32xf32> to vector<8x32xbf16>
    %cst_56 = arith.constant dense<0.000000e+00> : vector<8x128xf32>
    %259 = tpu.matmul %258, %3, %cst_56 {dimension_numbers = #tpu.dot_dimension_numbers<[1], [0], [0], [1], [0, 0, 1, 1], [], []>} : vector<8x32xbf16>, vector<32x128xbf16>, vector<8x128xf32> -> vector<8x128xf32>
    %260 = arith.truncf %216 : vector<8x32xf32> to vector<8x32xbf16>
    %cst_57 = arith.constant dense<0.000000e+00> : vector<8x128xf32>
    %261 = tpu.matmul %260, %1, %cst_57 {dimension_numbers = #tpu.dot_dimension_numbers<[1], [0], [0], [1], [0, 0, 1, 1], [], []>} : vector<8x32xbf16>, vector<32x128xbf16>, vector<8x128xf32> -> vector<8x128xf32>
    %262 = arith.addf %261, %259 : vector<8x128xf32>
    %263 = vector.broadcast %5 : vector<1x128xf32> to vector<8x128xf32>
    %264 = arith.addf %262, %263 : vector<8x128xf32>
    %265 = arith.negf %264 : vector<8x128xf32>
    %266 = math.exp %265 : vector<8x128xf32>
    %cst_58 = arith.constant 1.000000e+00 : f32
    %267 = vector.broadcast %cst_58 : f32 to vector<8x128xf32>
    %268 = arith.addf %267, %266 : vector<8x128xf32>
    %269 = arith.divf %267, %268 : vector<8x128xf32>
    %270 = math.tanh %264 : vector<8x128xf32>
    %271 = vector.extract_strided_slice %269 {offsets = [0, 0], sizes = [8, 32], strides = [1, 1]} : vector<8x128xf32> to vector<8x32xf32>
    %272 = vector.extract_strided_slice %269 {offsets = [0, 32], sizes = [8, 32], strides = [1, 1]} : vector<8x128xf32> to vector<8x32xf32>
    %273 = vector.extract_strided_slice %270 {offsets = [0, 64], sizes = [8, 32], strides = [1, 1]} : vector<8x128xf32> to vector<8x32xf32>
    %274 = vector.extract_strided_slice %269 {offsets = [0, 96], sizes = [8, 32], strides = [1, 1]} : vector<8x128xf32> to vector<8x32xf32>
    %275 = arith.mulf %272, %236 : vector<8x32xf32>
    %276 = arith.mulf %271, %273 : vector<8x32xf32>
    %277 = arith.addf %275, %276 : vector<8x32xf32>
    %278 = math.tanh %277 : vector<8x32xf32>
    %279 = arith.mulf %274, %278 : vector<8x32xf32>
    %280 = arith.truncf %257 : vector<8x32xf32> to vector<8x32xbf16>
    %cst_59 = arith.constant dense<0.000000e+00> : vector<8x128xf32>
    %281 = tpu.matmul %280, %2, %cst_59 {dimension_numbers = #tpu.dot_dimension_numbers<[1], [0], [0], [1], [0, 0, 1, 1], [], []>} : vector<8x32xbf16>, vector<32x128xbf16>, vector<8x128xf32> -> vector<8x128xf32>
    %c56 = arith.constant 56 : index
    %c0_60 = arith.constant 0 : index
    %282 = vector.load %arg10[%c56, %c0_60] : memref<64x128xf32, #tpu.memory_space<vmem>>, vector<8x128xf32>
    %283 = arith.addf %282, %281 : vector<8x128xf32>
    %284 = arith.negf %283 : vector<8x128xf32>
    %285 = math.exp %284 : vector<8x128xf32>
    %cst_61 = arith.constant 1.000000e+00 : f32
    %286 = vector.broadcast %cst_61 : f32 to vector<8x128xf32>
    %287 = arith.addf %286, %285 : vector<8x128xf32>
    %288 = arith.divf %286, %287 : vector<8x128xf32>
    %289 = math.tanh %283 : vector<8x128xf32>
    %290 = vector.extract_strided_slice %288 {offsets = [0, 0], sizes = [8, 32], strides = [1, 1]} : vector<8x128xf32> to vector<8x32xf32>
    %291 = vector.extract_strided_slice %288 {offsets = [0, 32], sizes = [8, 32], strides = [1, 1]} : vector<8x128xf32> to vector<8x32xf32>
    %292 = vector.extract_strided_slice %289 {offsets = [0, 64], sizes = [8, 32], strides = [1, 1]} : vector<8x128xf32> to vector<8x32xf32>
    %293 = vector.extract_strided_slice %288 {offsets = [0, 96], sizes = [8, 32], strides = [1, 1]} : vector<8x128xf32> to vector<8x32xf32>
    %294 = arith.mulf %291, %255 : vector<8x32xf32>
    %295 = arith.mulf %290, %292 : vector<8x32xf32>
    %296 = arith.addf %294, %295 : vector<8x32xf32>
    %297 = math.tanh %296 : vector<8x32xf32>
    %298 = arith.mulf %293, %297 : vector<8x32xf32>
    %299 = arith.truncf %279 : vector<8x32xf32> to vector<8x32xbf16>
    %cst_62 = arith.constant dense<0.000000e+00> : vector<8x128xf32>
    %300 = tpu.matmul %299, %3, %cst_62 {dimension_numbers = #tpu.dot_dimension_numbers<[1], [0], [0], [1], [0, 0, 1, 1], [], []>} : vector<8x32xbf16>, vector<32x128xbf16>, vector<8x128xf32> -> vector<8x128xf32>
    %301 = arith.truncf %257 : vector<8x32xf32> to vector<8x32xbf16>
    %cst_63 = arith.constant dense<0.000000e+00> : vector<8x128xf32>
    %302 = tpu.matmul %301, %1, %cst_63 {dimension_numbers = #tpu.dot_dimension_numbers<[1], [0], [0], [1], [0, 0, 1, 1], [], []>} : vector<8x32xbf16>, vector<32x128xbf16>, vector<8x128xf32> -> vector<8x128xf32>
    %303 = arith.addf %302, %300 : vector<8x128xf32>
    %304 = vector.broadcast %5 : vector<1x128xf32> to vector<8x128xf32>
    %305 = arith.addf %303, %304 : vector<8x128xf32>
    %306 = arith.negf %305 : vector<8x128xf32>
    %307 = math.exp %306 : vector<8x128xf32>
    %cst_64 = arith.constant 1.000000e+00 : f32
    %308 = vector.broadcast %cst_64 : f32 to vector<8x128xf32>
    %309 = arith.addf %308, %307 : vector<8x128xf32>
    %310 = arith.divf %308, %309 : vector<8x128xf32>
    %311 = math.tanh %305 : vector<8x128xf32>
    %312 = vector.extract_strided_slice %310 {offsets = [0, 0], sizes = [8, 32], strides = [1, 1]} : vector<8x128xf32> to vector<8x32xf32>
    %313 = vector.extract_strided_slice %310 {offsets = [0, 32], sizes = [8, 32], strides = [1, 1]} : vector<8x128xf32> to vector<8x32xf32>
    %314 = vector.extract_strided_slice %311 {offsets = [0, 64], sizes = [8, 32], strides = [1, 1]} : vector<8x128xf32> to vector<8x32xf32>
    %315 = vector.extract_strided_slice %310 {offsets = [0, 96], sizes = [8, 32], strides = [1, 1]} : vector<8x128xf32> to vector<8x32xf32>
    %316 = arith.mulf %313, %277 : vector<8x32xf32>
    %317 = arith.mulf %312, %314 : vector<8x32xf32>
    %318 = arith.addf %316, %317 : vector<8x32xf32>
    %319 = math.tanh %318 : vector<8x32xf32>
    %320 = arith.mulf %315, %319 : vector<8x32xf32>
    %321 = arith.truncf %320 : vector<8x32xf32> to vector<8x32xbf16>
    %cst_65 = arith.constant dense<0.000000e+00> : vector<8x128xf32>
    %322 = tpu.matmul %321, %3, %cst_65 {dimension_numbers = #tpu.dot_dimension_numbers<[1], [0], [0], [1], [0, 0, 1, 1], [], []>} : vector<8x32xbf16>, vector<32x128xbf16>, vector<8x128xf32> -> vector<8x128xf32>
    %323 = arith.truncf %298 : vector<8x32xf32> to vector<8x32xbf16>
    %cst_66 = arith.constant dense<0.000000e+00> : vector<8x128xf32>
    %324 = tpu.matmul %323, %1, %cst_66 {dimension_numbers = #tpu.dot_dimension_numbers<[1], [0], [0], [1], [0, 0, 1, 1], [], []>} : vector<8x32xbf16>, vector<32x128xbf16>, vector<8x128xf32> -> vector<8x128xf32>
    %325 = arith.addf %324, %322 : vector<8x128xf32>
    %326 = vector.broadcast %5 : vector<1x128xf32> to vector<8x128xf32>
    %327 = arith.addf %325, %326 : vector<8x128xf32>
    %328 = arith.negf %327 : vector<8x128xf32>
    %329 = math.exp %328 : vector<8x128xf32>
    %cst_67 = arith.constant 1.000000e+00 : f32
    %330 = vector.broadcast %cst_67 : f32 to vector<8x128xf32>
    %331 = arith.addf %330, %329 : vector<8x128xf32>
    %332 = arith.divf %330, %331 : vector<8x128xf32>
    %333 = math.tanh %327 : vector<8x128xf32>
    %334 = vector.extract_strided_slice %332 {offsets = [0, 0], sizes = [8, 32], strides = [1, 1]} : vector<8x128xf32> to vector<8x32xf32>
    %335 = vector.extract_strided_slice %332 {offsets = [0, 32], sizes = [8, 32], strides = [1, 1]} : vector<8x128xf32> to vector<8x32xf32>
    %336 = vector.extract_strided_slice %333 {offsets = [0, 64], sizes = [8, 32], strides = [1, 1]} : vector<8x128xf32> to vector<8x32xf32>
    %337 = vector.extract_strided_slice %332 {offsets = [0, 96], sizes = [8, 32], strides = [1, 1]} : vector<8x128xf32> to vector<8x32xf32>
    %338 = arith.mulf %335, %318 : vector<8x32xf32>
    %339 = arith.mulf %334, %336 : vector<8x32xf32>
    %340 = arith.addf %338, %339 : vector<8x32xf32>
    %341 = math.tanh %340 : vector<8x32xf32>
    %342 = arith.mulf %337, %341 : vector<8x32xf32>
    %343 = arith.truncf %342 : vector<8x32xf32> to vector<8x32xbf16>
    %c0_68 = arith.constant 0 : index
    %c0_69 = arith.constant 0 : index
    %344 = vector.load %arg7[%c0_68, %c0_69] : memref<32x128xbf16, #tpu.memory_space<vmem>>, vector<32x128xbf16>
    %cst_70 = arith.constant dense<0.000000e+00> : vector<8x128xf32>
    %345 = tpu.matmul %343, %344, %cst_70 {dimension_numbers = #tpu.dot_dimension_numbers<[1], [0], [0], [1], [0, 0, 1, 1], [], []>} : vector<8x32xbf16>, vector<32x128xbf16>, vector<8x128xf32> -> vector<8x128xf32>
    %c0_71 = arith.constant 0 : index
    %c0_72 = arith.constant 0 : index
    %346 = vector.load %arg8[%c0_71, %c0_72] : memref<1x128xf32, #tpu.memory_space<vmem>>, vector<1x128xf32>
    %347 = vector.broadcast %346 : vector<1x128xf32> to vector<8x128xf32>
    %348 = arith.addf %345, %347 : vector<8x128xf32>
    %c0_73 = arith.constant 0 : index
    %c0_74 = arith.constant 0 : index
    %349 = vector.load %arg9[%c0_73, %c0_74] : memref<8x128xf32, #tpu.memory_space<vmem>>, vector<8x128xf32>
    tpu.vector_store %arg9[%c0_73, %c0_74], %348 {strides = array<i32>} : memref<8x128xf32, #tpu.memory_space<vmem>>, vector<8x128xf32>,
    return
  }
}

</mosaic_0001>

<bundles_post_ra>
// kernel: tpu_custom_call.1
= control target key start
LH: loop header
LB: loop body
LE: loop exit
PB: predicated region body
PF: predicated region fallthrough
CT: control target
= control target key end

     0   :  { %14 = vsyncpa [#allocation4], 0  ;;  %s2838_s0 = inlined_call_operand.vmem [shape: bf16[64,32], index: 0, kind: input, shape index: {}]   ;;  %s2839_s1 = inlined_call_operand.vmem [shape: bf16[32,128], index: 1, kind: input, shape index: {}]   ;;  %s2840_s2 = inlined_call_operand.vmem [shape: bf16[32,128], index: 2, kind: input, shape index: {}]   ;;  %s2841_s3 = inlined_call_operand.vmem [shape: f32[1,128], index: 3, kind: input, shape index: {}]   ;;  %s2842_s4 = inlined_call_operand.vmem [shape: bf16[32,128], index: 4, kind: input, shape index: {}]   ;;  %s2843_s5 = inlined_call_operand.vmem [shape: bf16[32,128], index: 5, kind: input, shape index: {}]   ;;  %s2844_s6 = inlined_call_operand.vmem [shape: f32[1,128], index: 6, kind: input, shape index: {}]   ;;  %s2845_s7 = inlined_call_operand.hbm [shape: bf16[32,128], index: 7, kind: input, shape index: {}]   ;;  %s2846_s8 = inlined_call_operand.vmem [shape: f32[1,128], index: 8, kind: input, shape index: {}]   ;;  %s2847_s9 = inlined_call_operand.hbm [shape: f32[8,128], index: 9, kind: output, shape index: {}]  }
   0x1   :  { %15 = vsyncpa [#allocation5], 0  ;;  %s2357_s30 = smov [#allocation3]   ;;  %s2309_s13 = scalar_lea.hbm %s2845_s7, 256 }
   0x2   :  { %s35_s10 = sshll.u32 %s2357_s30, 4  ;;  %p2310_p0 = scmp.ne.s32.totalorder %s2845_s7, %s2309_s13  ;;  %s36_s10 = int_to_ptr.vmem [resolvable:$true] %s35_s10 }
   0x3   :  { %p2313_p1 = scmp.lt.u32.totalorder %s2309_s13, %s2845_s7 }
   0x5   :  { %p2315_p2 = pnand %p2313_p1, %p2310_p0 }
   0x7   :  { %2318 = shalt.err (!%p2315_p2)
}
   0x8   :  { %s2319_s18 = scalar_lea.vmem %s36_s10, 256  ;;  %p2324_p4 = scmp.lt.s32.totalorder %s36_s10, %s36_s10 }
   0x9   :  { %p2320_p3 = scmp.ne.s32.totalorder %s36_s10, %s2319_s18  ;;  %p2325_p5 = scmp.lt.s32.totalorder %s2319_s18, %s2319_s18 }
   0xb   :  { %p2326_p6 = por %p2325_p5, %p2324_p4 }
   0xd   :  { %p2327_p7 = pnand %p2326_p6, %p2320_p3 }
   0xf   :  { %2330 = shalt.err (!%p2327_p7)
}
  0x10   :  { %s2358_s19 = smov 64   ;;  %s2359_s20 = smov 4  }
  0x11   :  { %41 = dma.hbm_to_vmem [thread:$0]  %s2845_s7, 256, %s36_s10, [#allocation4], %s2358_s19, %s2358_s19, %s2359_s20  }
  0x12   :  { %2353 = dma.done.wait [#allocation4], 256  }
  0x13   :  { %2354 = vsyncadd [#allocation4], 4294967040  ;;  %v2360_v0 = vmov 0.0   ;;  %vm2361_vm0 = vmmov 0   ;;  %v2163_v1 = vld [vmem:[%s2839_s1] sm:$0xff]   ;;  %v2165_v3 = vld [vmem:[%s2839_s1 + $0x8] sm:$0xff]  }
  0x14   :  { %1955 = vmatprep.subr.bf16.mxu1 %v2360_v0  ;;  %1959 = vmatprep.mubr.msk.bf16.mxu1 %vm2361_vm0, %v2360_v0  ;;  %v2438_v2 = vld [vmem:[%s2840_s2] sm:$0xff]   ;;  %v2447_v4 = vld [vmem:[%s2840_s2 + $0x8] sm:$0xff]   ;;  %vm112_vm1 = vcmask 261120   ;;  %v2362_v7 = vmov 0   ;;  %s2363_s14 = smov 32   ;;  %v2170_v30 = vld [vmem:[%s2838_s0 + $0x10] sm:$0xff]  }
  0x15   :  { %1943 = vmatprep.subr.bf16.mxu0 %v2163_v1  ;;  %1956 = vmatpush3.bf16.msra.mxu1 %v2438_v2  ;;  %v2167_v5 = vld [vmem:[%s2838_s0] sm:$0xff]   ;;  %v2168_v6 = vld [vmem:[%s2838_s0 + $0x8] sm:$0xff]   ;;  %v2171_v31 = vld [vmem:[%s2838_s0 + $0x18] sm:$0xff]   ;;  %s2364_s12 = smov [#allocation6]  }
  0x16   :  { %1944 = vmatpush3.bf16.msra.mxu0 %v2163_v1  ;;  %1957 = vmatprep.subr.bf16.mxu1 %v2360_v0  ;;  %v2470_v8 = vld [vmem:[%s2841_s3] ss:$0 sm:$0xff]  ;;  %v2505_v33 = vld [vmem:[%s2843_s5 + $0x8] sm:$0xff]   ;;  %s1793_s1 = sshll.u32 %s2364_s12, 4  ;;  %s1794_s1 = int_to_ptr.vmem [resolvable:$true] %s1793_s1 }
  0x17   :  { %1945 = vmatprep.subr.bf16.mxu0 %v2165_v3  ;;  %1947 = vmatprep.mubr.msk.bf16.mxu0 %vm112_vm1, %v2167_v5  ;;  %v2487_v29 = vld [vmem:[%s2843_s5] sm:$0xff]   ;;  %v2534_v43 = vld [vmem:[%s2842_s4 + $0x8] sm:$0xff]   ;;  %p2336_p9 = scmp.lt.s32.totalorder %s1794_s1, %s1794_s1 }
  0x18   :  { %v2527_v41 = vld [vmem:[%s2842_s4] sm:$0xff]  }
  0x19   :  { %1958 = vmatpush3.bf16.msra.mxu1 %v2447_v4  ;;  %v2553_v54 = vld [vmem:[%s2844_s6] ss:$0 sm:$0xff] }
  0x1a   :  { %1946 = vmatpush3.bf16.msra.mxu0 %v2165_v3  ;;  %1963 = vmatprep.subr.bf16.mxu1 %v2360_v0 }
  0x1b   :  { %1971 = vmatprep.subr.bf16.mxu0 %v2360_v0 }
  0x1c   :  { %1960 = vmatmul.mubr.bf16.vlgmr.msra.gmra.mrb[0].mxu1 %v2362_v7 }
  0x1d   :  { %1948 = vmatmul.mubr.msk.bf16.vlgmr.msra.gmra.mrb[0].mxu0 %vm112_vm1, %v2168_v6  ;;  %1964 = vmatpush3.bf16.msra.mxu1 %v2438_v2 }
  0x1e   :  { %1967 = vmatprep.mubr.msk.bf16.mxu1 %vm2361_vm0, %v2360_v0  ;;  %1965 = vmatprep.subr.bf16.mxu1 %v2360_v0 }
  0x1f   :  { %1972 = vmatpush3.bf16.msra.mxu0 %v2487_v29  ;;  %1951 = vmatprep.mubr.msk.bf16.mxu0 %vm112_vm1, %v2170_v30 }
  0x20   :  { %1973 = vmatprep.subr.bf16.mxu0 %v2360_v0 }
  0x21   :  { %1966 = vmatpush3.bf16.msra.mxu1 %v2447_v4 }
  0x22   :  { %1979 = vmatprep.subr.bf16.mxu1 %v2360_v0 }
  0x23   :  { %1974 = vmatpush3.bf16.msra.mxu0 %v2505_v33 }
  0x24   :  { %1987 = vmatprep.subr.bf16.mxu0 %v2360_v0 }
  0x25   :  { %1952 = vmatmul.mubr.msk.bf16.gmra.mrb[4].mxu0 %vm112_vm1, %v2171_v31 }
  0x26   :  { %1975 = vmatprep.mubr.msk.bf16.mxu0 %vm2361_vm0, %v2360_v0 }
  0x2d   :  { %1976 = vmatmul.mubr.bf16.vlgmr.msra.gmra.mrb[8].mxu0 %v2362_v7 }
  0x2e   :  { %1988 = vmatpush3.bf16.msra.mxu0 %v2438_v2  ;;  %1991 = vmatprep.mubr.msk.bf16.mxu0 %vm2361_vm0, %v2360_v0 }
  0x2f   :  { %1989 = vmatprep.subr.bf16.mxu0 %v2360_v0 }
  0x32   :  { %1990 = vmatpush3.bf16.msra.mxu0 %v2447_v4 }
  0x33   :  { %2003 = vmatprep.subr.bf16.mxu0 %v2360_v0 }
  0xef   :  { %v247_v10 = vpop.f32.mrb[0].mxu1 }
  0xf0   :  { %v2472_v9 = vpop.f32.mrb[0].mxu0  ;;  %v1961_v12 = vpop.f32.mrb[1].mxu1 }
  0xf1   :  { %v159_v11 = vpop.f32.mrb[1].mxu0  ;;  %v250_v15 = vpop.f32.mrb[2].mxu1 }
  0xf2   :  { %v160_v13 = vadd.f32 %v2470_v8, %v159_v11  ;;  %v2475_v14 = vpop.f32.mrb[2].mxu0  ;;  %v1962_v17 = vpop.f32.mrb[3].mxu1 }
  0xf3   :  { %v2477_v16 = vpop.f32.mrb[3].mxu0 }
  0xf4   :  { %v254_v18 = vadd.f32 %v247_v10, %v160_v13  ;;  %v163_v48 = vadd.f32 %v2470_v8, %v2477_v16 }
  0xf6   :  { %2177 = vtanh.f32 %v254_v18  ;;  %v1815_v20 = vmul.f32 -1.442695, %v254_v18 }
  0xf8   :  { %2179 = vpow2.f32 %v1815_v20  ;;  %v2516_v37 = vpop.f32.mrb[4].mxu0 }
  0xf9   :  { %v2518_v38 = vpop.f32.mrb[5].mxu0 }
  0xfa   :  { %v2520_v39 = vpop.f32.mrb[6].mxu0 }
  0xfb   :  { %v2522_v40 = vpop.f32.mrb[7].mxu0 }
 0x100   :  { %v2178_v19 = vpop.eup %2177  ;;  %v398_v44 = vpop.f32.mrb[8].mxu0 }
 0x101   :  { %264 = vrot.lane.b32.xlu0 %v2178_v19, %s2358_s19  ;;  %v1977_v45 = vpop.f32.mrb[9].mxu0 }
 0x102   :  { %v2180_v21 = vpop.eup %2179  ;;  %v401_v46 = vpop.f32.mrb[10].mxu0 }
 0x103   :  { %v258_v22 = vadd.f32 1.0, %v2180_v21  ;;  %v1978_v47 = vpop.f32.mrb[11].mxu0 }
 0x105   :  { %2181 = vrcp.f32 %v258_v22 }
 0x10f   :  { %v2182_v23 = vpop.eup %2181 }
 0x110   :  { %v262_v26 = vmul.f32 0.0, %v2182_v23 }
 0x173   :  { %v265_v24 = vpop.permute.xlu0 %264 }
 0x174   :  { %v267_v25 = vmul.f32 %v2182_v23, %v265_v24 }
 0x176   :  { %269 = vrot.lane.b32.xlu0 %v267_v25, %s2363_s14 }
 0x1e8   :  { %v270_v27 = vpop.permute.xlu0 %269 }
 0x1e9   :  { %v2481_v28 = vadd.f32 %v270_v27, %v262_v26 }
 0x1eb   :  { %2183 = vtanh.f32 %v2481_v28 }
 0x1f5   :  { %v2184_v32 = vpop.eup %2183 }
 0x1f6   :  { %275 = vrot.lane.b32.xlu1 %v2184_v32, %s2358_s19 }
 0x268   :  { %v276_v34 = vpop.permute.xlu1 %275 }
 0x269   :  { %v278_v35 = vmul.f32 %v2182_v23, %v276_v34 }
 0x26b   :  { %v279_v36 = vpack.c.bf16 %v278_v35, %v278_v35  ;;  %v168_v35 = vadd.f32 %v2472_v9, %v2470_v8 }
 0x26d   :  { %281 = vrot.lane.b32.xlu1 %v279_v36, %s2363_s14 }
 0x2df   :  { %v282_v42 = vpop.permute.xlu1 %281 }
 0x2e0   :  { %1968 = vmatmul.mubr.msk.bf16.vlgmr.msra.gmra.mrb[4].mxu1 %vm112_vm1, %v282_v42 }
 0x2e1   :  { %1980 = vmatpush3.bf16.msra.mxu1 %v2527_v41  ;;  %1983 = vmatprep.mubr.msk.bf16.mxu1 %vm2361_vm0, %v2360_v0 }
 0x2e2   :  { %1981 = vmatprep.subr.bf16.mxu1 %v2360_v0 }
 0x2e5   :  { %1982 = vmatpush3.bf16.msra.mxu1 %v2534_v43 }
 0x2e6   :  { %1995 = vmatprep.subr.bf16.mxu1 %v2360_v0 }
 0x2e8   :  { %1984 = vmatmul.mubr.msk.bf16.vlgmr.msra.gmra.mrb[8].mxu1 %vm112_vm1, %v282_v42 }
 0x2e9   :  { %1996 = vmatpush3.bf16.msra.mxu1 %v2487_v29  ;;  %1999 = vmatprep.mubr.msk.bf16.mxu1 %vm2361_vm0, %v2360_v0 }
 0x2ea   :  { %1997 = vmatprep.subr.bf16.mxu1 %v2360_v0 }
 0x2ed   :  { %1998 = vmatpush3.bf16.msra.mxu1 %v2505_v33 }
 0x2ee   :  { %2011 = vmatprep.subr.bf16.mxu1 %v2360_v0 }
 0x3b3   :  { %v320_v49 = vpop.f32.mrb[4].mxu1 }
 0x3b4   :  { %v327_v50 = vadd.f32 %v320_v49, %v163_v48  ;;  %v1969_v51 = vpop.f32.mrb[5].mxu1 }
 0x3b5   :  { %v323_v52 = vpop.f32.mrb[6].mxu1 }
 0x3b6   :  { %2185 = vtanh.f32 %v327_v50  ;;  %v1970_v53 = vpop.f32.mrb[7].mxu1  ;;  %v1817_v63 = vmul.f32 -1.442695, %v327_v50 }
 0x3bb   :  { %v450_v55 = vpop.f32.mrb[8].mxu1 }
 0x3bc   :  { %v451_v56 = vadd.f32 %v450_v55, %v398_v44  ;;  %v1985_v57 = vpop.f32.mrb[9].mxu1 }
 0x3bd   :  { %v453_v58 = vpop.f32.mrb[10].mxu1 }
 0x3be   :  { %v462_v59 = vadd.f32 %v2553_v54, %v451_v56  ;;  %v1986_v60 = vpop.f32.mrb[11].mxu1 }
 0x3c0   :  { %v2186_v61 = vpop.eup %2185  ;;  %2187 = vtanh.f32 %v462_v59  ;;  %v1824_v1 = vmul.f32 -1.442695, %v462_v59 }
 0x3c1   :  { %337 = vrot.lane.b32.xlu0 %v2186_v61, %s2358_s19  ;;  %2189 = vpow2.f32 %v1817_v63 }
 0x3c2   :  { %2191 = vpow2.f32 %v1824_v1 }
 0x3ca   :  { %v2188_v62 = vpop.eup %2187 }
 0x3cb   :  { %472 = vrot.lane.b32.xlu1 %v2188_v62, %s2358_s19  ;;  %v2190_v3 = vpop.eup %2189 }
 0x3cc   :  { %v331_v5 = vadd.f32 1.0, %v2190_v3  ;;  %v2192_v6 = vpop.eup %2191 }
 0x3cd   :  { %v466_v7 = vadd.f32 1.0, %v2192_v6 }
 0x3ce   :  { %2193 = vrcp.f32 %v331_v5 }
 0x3cf   :  { %2195 = vrcp.f32 %v466_v7 }
 0x3d8   :  { %v2194_v10 = vpop.eup %2193 }
 0x3d9   :  { %v2196_v13 = vpop.eup %2195  ;;  %v335_v17 = vmul.f32 %v2194_v10, %v2481_v28 }
 0x3da   :  { %v470_v20 = vmul.f32 0.0, %v2196_v13 }
 0x433   :  { %v338_v11 = vpop.permute.xlu0 %337 }
 0x434   :  { %v340_v12 = vmul.f32 %v2194_v10, %v338_v11 }
 0x436   :  { %342 = vrot.lane.b32.xlu0 %v340_v12, %s2363_s14 }
 0x43d   :  { %v473_v15 = vpop.permute.xlu1 %472 }
 0x43e   :  { %v475_v16 = vmul.f32 %v2196_v13, %v473_v15 }
 0x440   :  { %477 = vrot.lane.b32.xlu1 %v475_v16, %s2363_s14 }
 0x4a8   :  { %v343_v18 = vpop.permute.xlu0 %342 }
 0x4a9   :  { %v2561_v19 = vadd.f32 %v343_v18, %v335_v17 }
 0x4ab   :  { %2197 = vtanh.f32 %v2561_v19 }
 0x4b2   :  { %v478_v21 = vpop.permute.xlu1 %477 }
 0x4b3   :  { %v2564_v22 = vadd.f32 %v478_v21, %v470_v20 }
 0x4b5   :  { %v2198_v23 = vpop.eup %2197  ;;  %2199 = vtanh.f32 %v2564_v22 }
 0x4b6   :  { %348 = vrot.lane.b32.xlu0 %v2198_v23, %s2358_s19 }
 0x4bf   :  { %v2200_v24 = vpop.eup %2199 }
 0x4c0   :  { %483 = vrot.lane.b32.xlu1 %v2200_v24, %s2358_s19 }
 0x528   :  { %v349_v25 = vpop.permute.xlu0 %348 }
 0x529   :  { %v351_v26 = vmul.f32 %v2194_v10, %v349_v25 }
 0x52b   :  { %v487_v27 = vpack.c.bf16 %v351_v26, %v351_v26 }
 0x52d   :  { %489 = vrot.lane.b32.xlu0 %v487_v27, %s2363_s14 }
 0x532   :  { %v484_v28 = vpop.permute.xlu1 %483 }
 0x533   :  { %v486_v30 = vmul.f32 %v2196_v13, %v484_v28 }
 0x535   :  { %v560_v31 = vpack.c.bf16 %v486_v30, %v486_v30  ;;  %v171_v30 = vadd.f32 %v2475_v14, %v2470_v8 }
 0x537   :  { %562 = vrot.lane.b32.xlu1 %v560_v31, %s2363_s14 }
 0x59f   :  { %v490_v32 = vpop.permute.xlu0 %489 }
 0x5a0   :  { %1992 = vmatmul.mubr.msk.bf16.vlgmr.msra.gmra.mrb[12].mxu0 %vm112_vm1, %v490_v32 }
 0x5a1   :  { %2004 = vmatpush3.bf16.msra.mxu0 %v2527_v41  ;;  %2007 = vmatprep.mubr.msk.bf16.mxu0 %vm2361_vm0, %v2360_v0 }
 0x5a2   :  { %2005 = vmatprep.subr.bf16.mxu0 %v2360_v0 }
 0x5a5   :  { %2006 = vmatpush3.bf16.msra.mxu0 %v2534_v43 }
 0x5a6   :  { %2019 = vmatprep.subr.bf16.mxu0 %v2360_v0 }
 0x5a8   :  { %2008 = vmatmul.mubr.msk.bf16.vlgmr.msra.gmra.mrb[16].mxu0 %vm112_vm1, %v490_v32 }
 0x5a9   :  { %v563_v34 = vpop.permute.xlu1 %562  ;;  %2020 = vmatpush3.bf16.msra.mxu0 %v2487_v29  ;;  %2023 = vmatprep.mubr.msk.bf16.mxu0 %vm2361_vm0, %v2360_v0 }
 0x5aa   :  { %2000 = vmatmul.mubr.msk.bf16.vlgmr.msra.gmra.mrb[12].mxu1 %vm112_vm1, %v563_v34  ;;  %2021 = vmatprep.subr.bf16.mxu0 %v2360_v0 }
 0x5ab   :  { %2012 = vmatpush3.bf16.msra.mxu1 %v2438_v2  ;;  %2015 = vmatprep.mubr.msk.bf16.mxu1 %vm2361_vm0, %v2360_v0 }
 0x5ac   :  { %2013 = vmatprep.subr.bf16.mxu1 %v2360_v0 }
 0x5ad   :  { %2022 = vmatpush3.bf16.msra.mxu0 %v2505_v33 }
 0x5ae   :  { %2035 = vmatprep.subr.bf16.mxu0 %v2360_v0 }
 0x5af   :  { %2014 = vmatpush3.bf16.msra.mxu1 %v2447_v4 }
 0x5b0   :  { %2027 = vmatprep.subr.bf16.mxu1 %v2360_v0 }
 0x673   :  { %v528_v36 = vpop.f32.mrb[12].mxu0 }
 0x674   :  { %v535_v42 = vadd.f32 %v528_v36, %v168_v35  ;;  %v1993_v44 = vpop.f32.mrb[13].mxu0 }
 0x675   :  { %v531_v45 = vpop.f32.mrb[14].mxu0 }
 0x676   :  { %2201 = vtanh.f32 %v535_v42  ;;  %v1994_v46 = vpop.f32.mrb[15].mxu0  ;;  %v1826_v59 = vmul.f32 -1.442695, %v535_v42 }
 0x67b   :  { %v641_v47 = vpop.f32.mrb[16].mxu0 }
 0x67c   :  { %v2009_v48 = vpop.f32.mrb[17].mxu0 }
 0x67d   :  { %v601_v49 = vpop.f32.mrb[12].mxu1  ;;  %v644_v50 = vpop.f32.mrb[18].mxu0 }
 0x67e   :  { %v642_v51 = vadd.f32 %v641_v47, %v601_v49  ;;  %v2001_v52 = vpop.f32.mrb[13].mxu1  ;;  %v2010_v53 = vpop.f32.mrb[19].mxu0 }
 0x67f   :  { %v604_v55 = vpop.f32.mrb[14].mxu1 }
 0x680   :  { %v2202_v56 = vpop.eup %2201  ;;  %v647_v57 = vadd.f32 %v2553_v54, %v642_v51  ;;  %v2002_v58 = vpop.f32.mrb[15].mxu1 }
 0x681   :  { %545 = vrot.lane.b32.xlu0 %v2202_v56, %s2358_s19 }
 0x682   :  { %2203 = vtanh.f32 %v647_v57  ;;  %v1829_v60 = vmul.f32 -1.442695, %v647_v57 }
 0x683   :  { %2205 = vpow2.f32 %v1826_v59 }
 0x684   :  { %2207 = vpow2.f32 %v1829_v60 }
 0x68c   :  { %v2204_v9 = vpop.eup %2203 }
 0x68d   :  { %657 = vrot.lane.b32.xlu1 %v2204_v9, %s2358_s19  ;;  %v2206_v61 = vpop.eup %2205 }
 0x68e   :  { %v539_v62 = vadd.f32 1.0, %v2206_v61  ;;  %v2208_v63 = vpop.eup %2207 }
 0x68f   :  { %v651_v1 = vadd.f32 1.0, %v2208_v63 }
 0x690   :  { %2209 = vrcp.f32 %v539_v62 }
 0x691   :  { %2211 = vrcp.f32 %v651_v1 }
 0x69a   :  { %v2210_v3 = vpop.eup %2209 }
 0x69b   :  { %v2212_v7 = vpop.eup %2211  ;;  %v543_v12 = vmul.f32 %v2210_v3, %v2561_v19 }
 0x69c   :  { %v655_v16 = vmul.f32 %v2212_v7, %v2564_v22 }
 0x6f3   :  { %v546_v5 = vpop.permute.xlu0 %545 }
 0x6f4   :  { %v548_v6 = vmul.f32 %v2210_v3, %v546_v5 }
 0x6f6   :  { %550 = vrot.lane.b32.xlu0 %v548_v6, %s2363_s14 }
 0x6ff   :  { %v658_v10 = vpop.permute.xlu1 %657 }
 0x700   :  { %v660_v11 = vmul.f32 %v2212_v7, %v658_v10 }
 0x702   :  { %662 = vrot.lane.b32.xlu1 %v660_v11, %s2363_s14 }
 0x768   :  { %v551_v13 = vpop.permute.xlu0 %550 }
 0x769   :  { %v2600_v15 = vadd.f32 %v551_v13, %v543_v12 }
 0x76b   :  { %2213 = vtanh.f32 %v2600_v15 }
 0x774   :  { %v663_v17 = vpop.permute.xlu1 %662 }
 0x775   :  { %v2214_v18 = vpop.eup %2213  ;;  %v2604_v20 = vadd.f32 %v663_v17, %v655_v16 }
 0x776   :  { %556 = vrot.lane.b32.xlu0 %v2214_v18, %s2358_s19 }
 0x777   :  { %2215 = vtanh.f32 %v2604_v20 }
 0x781   :  { %v2216_v21 = vpop.eup %2215 }
 0x782   :  { %668 = vrot.lane.b32.xlu1 %v2216_v21, %s2358_s19 }
 0x7e8   :  { %v557_v23 = vpop.permute.xlu0 %556 }
 0x7e9   :  { %v559_v19 = vmul.f32 %v2210_v3, %v557_v23 }
 0x7eb   :  { %v672_v24 = vpack.c.bf16 %v559_v19, %v559_v19 }
 0x7ed   :  { %674 = vrot.lane.b32.xlu0 %v672_v24, %s2363_s14 }
 0x7f4   :  { %v669_v25 = vpop.permute.xlu1 %668 }
 0x7f5   :  { %v671_v26 = vmul.f32 %v2212_v7, %v669_v25  ;;  %v176_v25 = vadd.f32 %v2470_v8, %v2518_v38 }
 0x7f7   :  { %v745_v27 = vpack.c.bf16 %v671_v26, %v671_v26 }
 0x7f9   :  { %747 = vrot.lane.b32.xlu1 %v745_v27, %s2363_s14 }
 0x85f   :  { %v675_v22 = vpop.permute.xlu0 %674 }
 0x860   :  { %2016 = vmatmul.mubr.msk.bf16.vlgmr.msra.gmra.mrb[16].mxu1 %vm112_vm1, %v675_v22 }
 0x861   :  { %2028 = vmatpush3.bf16.msra.mxu1 %v2527_v41  ;;  %2031 = vmatprep.mubr.msk.bf16.mxu1 %vm2361_vm0, %v2360_v0 }
 0x862   :  { %2029 = vmatprep.subr.bf16.mxu1 %v2360_v0 }
 0x865   :  { %2030 = vmatpush3.bf16.msra.mxu1 %v2534_v43 }
 0x866   :  { %2043 = vmatprep.subr.bf16.mxu1 %v2360_v0 }
 0x868   :  { %2032 = vmatmul.mubr.msk.bf16.vlgmr.msra.gmra.mrb[20].mxu1 %vm112_vm1, %v675_v22 }
 0x869   :  { %2044 = vmatpush3.bf16.msra.mxu1 %v2487_v29  ;;  %2047 = vmatprep.mubr.msk.bf16.mxu1 %vm2361_vm0, %v2360_v0 }
 0x86a   :  { %2045 = vmatprep.subr.bf16.mxu1 %v2360_v0 }
 0x86b   :  { %v748_v28 = vpop.permute.xlu1 %747 }
 0x86c   :  { %2024 = vmatmul.mubr.msk.bf16.vlgmr.msra.gmra.mrb[20].mxu0 %vm112_vm1, %v748_v28 }
 0x86d   :  { %2036 = vmatpush3.bf16.msra.mxu0 %v2438_v2  ;;  %2039 = vmatprep.mubr.msk.bf16.mxu0 %vm2361_vm0, %v2360_v0 }
 0x86e   :  { %2037 = vmatprep.subr.bf16.mxu0 %v2360_v0  ;;  %2046 = vmatpush3.bf16.msra.mxu1 %v2505_v33 }
 0x86f   :  { %2059 = vmatprep.subr.bf16.mxu1 %v2360_v0 }
 0x871   :  { %2038 = vmatpush3.bf16.msra.mxu0 %v2447_v4 }
 0x872   :  { %2051 = vmatprep.subr.bf16.mxu0 %v2360_v0 }
 0x933   :  { %v713_v31 = vpop.f32.mrb[16].mxu1 }
 0x934   :  { %v720_v32 = vadd.f32 %v713_v31, %v171_v30  ;;  %v2017_v34 = vpop.f32.mrb[17].mxu1 }
 0x935   :  { %v716_v35 = vpop.f32.mrb[18].mxu1 }
 0x936   :  { %2217 = vtanh.f32 %v720_v32  ;;  %v2018_v36 = vpop.f32.mrb[19].mxu1  ;;  %v1831_v55 = vmul.f32 -1.442695, %v720_v32 }
 0x93b   :  { %v826_v42 = vpop.f32.mrb[20].mxu1 }
 0x93c   :  { %v2033_v44 = vpop.f32.mrb[21].mxu1 }
 0x93d   :  { %v829_v45 = vpop.f32.mrb[22].mxu1 }
 0x93e   :  { %v2034_v46 = vpop.f32.mrb[23].mxu1 }
 0x93f   :  { %v786_v47 = vpop.f32.mrb[20].mxu0 }
 0x940   :  { %v2218_v48 = vpop.eup %2217  ;;  %v827_v49 = vadd.f32 %v826_v42, %v786_v47  ;;  %v2025_v50 = vpop.f32.mrb[21].mxu0 }
 0x941   :  { %v789_v51 = vpop.f32.mrb[22].mxu0  ;;  %730 = vrot.lane.b32.xlu0 %v2218_v48, %s2358_s19 }
 0x942   :  { %v832_v52 = vadd.f32 %v2553_v54, %v827_v49  ;;  %v2026_v14 = vpop.f32.mrb[23].mxu0 }
 0x944   :  { %2219 = vtanh.f32 %v832_v52  ;;  %v1834_v57 = vmul.f32 -1.442695, %v832_v52 }
 0x945   :  { %2221 = vpow2.f32 %v1831_v55 }
 0x946   :  { %2223 = vpow2.f32 %v1834_v57 }
 0x94e   :  { %v2220_v53 = vpop.eup %2219 }
 0x94f   :  { %842 = vrot.lane.b32.xlu1 %v2220_v53, %s2358_s19  ;;  %v2222_v56 = vpop.eup %2221 }
 0x950   :  { %v724_v58 = vadd.f32 1.0, %v2222_v56  ;;  %v2224_v9 = vpop.eup %2223 }
 0x951   :  { %v836_v60 = vadd.f32 1.0, %v2224_v9 }
 0x952   :  { %2225 = vrcp.f32 %v724_v58 }
 0x953   :  { %2227 = vrcp.f32 %v836_v60 }
 0x95c   :  { %v2226_v59 = vpop.eup %2225 }
 0x95d   :  { %v2228_v63 = vpop.eup %2227  ;;  %v728_v5 = vmul.f32 %v2226_v59, %v2600_v15 }
 0x95e   :  { %v840_v11 = vmul.f32 %v2228_v63, %v2604_v20 }
 0x9b3   :  { %v731_v61 = vpop.permute.xlu0 %730 }
 0x9b4   :  { %v733_v62 = vmul.f32 %v2226_v59, %v731_v61 }
 0x9b6   :  { %735 = vrot.lane.b32.xlu0 %v733_v62, %s2363_s14 }
 0x9c1   :  { %v843_v1 = vpop.permute.xlu1 %842 }
 0x9c2   :  { %v845_v3 = vmul.f32 %v2228_v63, %v843_v1 }
 0x9c4   :  { %847 = vrot.lane.b32.xlu1 %v845_v3, %s2363_s14 }
 0xa28   :  { %v736_v6 = vpop.permute.xlu0 %735 }
 0xa29   :  { %v2640_v7 = vadd.f32 %v736_v6, %v728_v5 }
 0xa2b   :  { %2229 = vtanh.f32 %v2640_v7 }
 0xa35   :  { %v2230_v10 = vpop.eup %2229 }
 0xa36   :  { %741 = vrot.lane.b32.xlu0 %v2230_v10, %s2358_s19  ;;  %v848_v12 = vpop.permute.xlu1 %847 }
 0xa37   :  { %v2645_v13 = vadd.f32 %v848_v12, %v840_v11 }
 0xa39   :  { %2231 = vtanh.f32 %v2645_v13 }
 0xa43   :  { %v2232_v16 = vpop.eup %2231 }
 0xa44   :  { %853 = vrot.lane.b32.xlu1 %v2232_v16, %s2358_s19 }
 0xaa8   :  { %v742_v17 = vpop.permute.xlu0 %741 }
 0xaa9   :  { %v744_v15 = vmul.f32 %v2226_v59, %v742_v17 }
 0xaab   :  { %v857_v18 = vpack.c.bf16 %v744_v15, %v744_v15 }
 0xaad   :  { %859 = vrot.lane.b32.xlu0 %v857_v18, %s2363_s14  ;;  %v179_v18 = vadd.f32 %v2470_v8, %v2522_v40 }
 0xab6   :  { %v854_v21 = vpop.permute.xlu1 %853 }
 0xab7   :  { %v856_v23 = vmul.f32 %v2228_v63, %v854_v21 }
 0xab9   :  { %v930_v19 = vpack.c.bf16 %v856_v23, %v856_v23 }
 0xabb   :  { %932 = vrot.lane.b32.xlu1 %v930_v19, %s2363_s14 }
 0xb1f   :  { %v860_v20 = vpop.permute.xlu0 %859 }
 0xb20   :  { %2040 = vmatmul.mubr.msk.bf16.vlgmr.msra.gmra.mrb[24].mxu0 %vm112_vm1, %v860_v20 }
 0xb21   :  { %2052 = vmatpush3.bf16.msra.mxu0 %v2527_v41  ;;  %2055 = vmatprep.mubr.msk.bf16.mxu0 %vm2361_vm0, %v2360_v0 }
 0xb22   :  { %2053 = vmatprep.subr.bf16.mxu0 %v2360_v0 }
 0xb25   :  { %2054 = vmatpush3.bf16.msra.mxu0 %v2534_v43 }
 0xb26   :  { %2067 = vmatprep.subr.bf16.mxu0 %v2360_v0 }
 0xb28   :  { %2056 = vmatmul.mubr.msk.bf16.vlgmr.msra.gmra.mrb[28].mxu0 %vm112_vm1, %v860_v20 }
 0xb29   :  { %2068 = vmatpush3.bf16.msra.mxu0 %v2487_v29  ;;  %2071 = vmatprep.mubr.msk.bf16.mxu0 %vm2361_vm0, %v2360_v0 }
 0xb2a   :  { %2069 = vmatprep.subr.bf16.mxu0 %v2360_v0 }
 0xb2d   :  { %v933_v24 = vpop.permute.xlu1 %932  ;;  %2070 = vmatpush3.bf16.msra.mxu0 %v2505_v33 }
 0xb2e   :  { %2048 = vmatmul.mubr.msk.bf16.vlgmr.msra.gmra.mrb[24].mxu1 %vm112_vm1, %v933_v24  ;;  %2083 = vmatprep.subr.bf16.mxu0 %v2360_v0 }
 0xb2f   :  { %2060 = vmatpush3.bf16.msra.mxu1 %v2438_v2  ;;  %2063 = vmatprep.mubr.msk.bf16.mxu1 %vm2361_vm0, %v2360_v0 }
 0xb30   :  { %2061 = vmatprep.subr.bf16.mxu1 %v2360_v0 }
 0xb33   :  { %2062 = vmatpush3.bf16.msra.mxu1 %v2447_v4 }
 0xb34   :  { %2075 = vmatprep.subr.bf16.mxu1 %v2360_v0 }
 0xbf3   :  { %v898_v26 = vpop.f32.mrb[24].mxu0 }
 0xbf4   :  { %v905_v27 = vadd.f32 %v898_v26, %v176_v25  ;;  %v2041_v22 = vpop.f32.mrb[25].mxu0 }
 0xbf5   :  { %v901_v28 = vpop.f32.mrb[26].mxu0 }
 0xbf6   :  { %2233 = vtanh.f32 %v905_v27  ;;  %v2042_v30 = vpop.f32.mrb[27].mxu0  ;;  %v1836_v49 = vmul.f32 -1.442695, %v905_v27 }
 0xbfb   :  { %v1011_v31 = vpop.f32.mrb[28].mxu0 }
 0xbfc   :  { %v2057_v32 = vpop.f32.mrb[29].mxu0 }
 0xbfd   :  { %v1014_v34 = vpop.f32.mrb[30].mxu0 }
 0xbfe   :  { %v2058_v35 = vpop.f32.mrb[31].mxu0 }
 0xc00   :  { %v2234_v36 = vpop.eup %2233 }
 0xc01   :  { %915 = vrot.lane.b32.xlu0 %v2234_v36, %s2358_s19  ;;  %v971_v42 = vpop.f32.mrb[24].mxu1 }
 0xc02   :  { %v1012_v44 = vadd.f32 %v1011_v31, %v971_v42  ;;  %v2049_v45 = vpop.f32.mrb[25].mxu1 }
 0xc03   :  { %v974_v46 = vpop.f32.mrb[26].mxu1 }
 0xc04   :  { %v1017_v47 = vadd.f32 %v2553_v54, %v1012_v44  ;;  %v2050_v38 = vpop.f32.mrb[27].mxu1 }
 0xc06   :  { %2235 = vtanh.f32 %v1017_v47  ;;  %v1839_v51 = vmul.f32 -1.442695, %v1017_v47 }
 0xc07   :  { %2237 = vpow2.f32 %v1836_v49 }
 0xc08   :  { %2239 = vpow2.f32 %v1839_v51 }
 0xc10   :  { %v2236_v48 = vpop.eup %2235 }
 0xc11   :  { %1027 = vrot.lane.b32.xlu1 %v2236_v48, %s2358_s19  ;;  %v2238_v50 = vpop.eup %2237 }
 0xc12   :  { %v909_v52 = vadd.f32 1.0, %v2238_v50  ;;  %v2240_v14 = vpop.eup %2239 }
 0xc13   :  { %v1021_v57 = vadd.f32 1.0, %v2240_v14 }
 0xc14   :  { %2241 = vrcp.f32 %v909_v52 }
 0xc15   :  { %2243 = vrcp.f32 %v1021_v57 }
 0xc1e   :  { %v2242_v53 = vpop.eup %2241 }
 0xc1f   :  { %v2244_v58 = vpop.eup %2243  ;;  %v913_v60 = vmul.f32 %v2242_v53, %v2640_v7 }
 0xc20   :  { %v1025_v1 = vmul.f32 %v2244_v58, %v2645_v13 }
 0xc73   :  { %v916_v55 = vpop.permute.xlu0 %915 }
 0xc74   :  { %v918_v56 = vmul.f32 %v2242_v53, %v916_v55 }
 0xc76   :  { %920 = vrot.lane.b32.xlu0 %v918_v56, %s2363_s14 }
 0xc83   :  { %v1028_v9 = vpop.permute.xlu1 %1027 }
 0xc84   :  { %v1030_v59 = vmul.f32 %v2244_v58, %v1028_v9 }
 0xc86   :  { %1032 = vrot.lane.b32.xlu1 %v1030_v59, %s2363_s14 }
 0xce8   :  { %v921_v61 = vpop.permute.xlu0 %920 }
 0xce9   :  { %v2680_v62 = vadd.f32 %v921_v61, %v913_v60 }
 0xceb   :  { %2245 = vtanh.f32 %v2680_v62 }
 0xcf5   :  { %v2246_v63 = vpop.eup %2245 }
 0xcf6   :  { %926 = vrot.lane.b32.xlu0 %v2246_v63, %s2358_s19 }
 0xcf8   :  { %v1033_v3 = vpop.permute.xlu1 %1032 }
 0xcf9   :  { %v2685_v5 = vadd.f32 %v1033_v3, %v1025_v1 }
 0xcfb   :  { %2247 = vtanh.f32 %v2685_v5 }
 0xd05   :  { %v2248_v6 = vpop.eup %2247 }
 0xd06   :  { %1038 = vrot.lane.b32.xlu1 %v2248_v6, %s2358_s19 }
 0xd68   :  { %v927_v10 = vpop.permute.xlu0 %926 }
 0xd69   :  { %v929_v7 = vmul.f32 %v2242_v53, %v927_v10  ;;  %v2305_v10 = vld [vmem:[%s2840_s2] sm:$0xff]  }
 0xd6b   :  { %v1042_v11 = vpack.c.bf16 %v929_v7, %v929_v7 }
 0xd6d   :  { %1044 = vrot.lane.b32.xlu0 %v1042_v11, %s2363_s14 }
 0xd78   :  { %v1039_v12 = vpop.permute.xlu1 %1038 }
 0xd79   :  { %v1041_v16 = vmul.f32 %v2244_v58, %v1039_v12 }
 0xd7b   :  { %v1115_v17 = vpack.c.bf16 %v1041_v16, %v1041_v16 }
 0xd7d   :  { %1117 = vrot.lane.b32.xlu1 %v1115_v17, %s2363_s14 }
 0xddf   :  { %v1045_v15 = vpop.permute.xlu0 %1044 }
 0xde0   :  { %2064 = vmatmul.mubr.msk.bf16.vlgmr.msra.gmra.mrb[28].mxu1 %vm112_vm1, %v1045_v15 }
 0xde1   :  { %2076 = vmatpush3.bf16.msra.mxu1 %v2527_v41  ;;  %2079 = vmatprep.mubr.msk.bf16.mxu1 %vm2361_vm0, %v2360_v0 }
 0xde2   :  { %2077 = vmatprep.subr.bf16.mxu1 %v2360_v0 }
 0xde5   :  { %2078 = vmatpush3.bf16.msra.mxu1 %v2534_v43 }
 0xde6   :  { %2091 = vmatprep.subr.bf16.mxu1 %v2360_v0 }
 0xde8   :  { %2080 = vmatmul.mubr.msk.bf16.vlgmr.msra.gmra.mrb[32].mxu1 %vm112_vm1, %v1045_v15 }
 0xde9   :  { %2092 = vmatpush3.bf16.msra.mxu1 %v2487_v29  ;;  %2095 = vmatprep.mubr.msk.bf16.mxu1 %vm2361_vm0, %v2360_v0 }
 0xdea   :  { %2093 = vmatprep.subr.bf16.mxu1 %v2360_v0 }
 0xded   :  { %2094 = vmatpush3.bf16.msra.mxu1 %v2505_v33 }
 0xdee   :  { %2107 = vmatprep.subr.bf16.mxu1 %v2360_v0 }
 0xdef   :  { %v1118_v13 = vpop.permute.xlu1 %1117 }
 0xdf0   :  { %2072 = vmatmul.mubr.msk.bf16.vlgmr.msra.gmra.mrb[32].mxu0 %vm112_vm1, %v1118_v13 }
 0xdf1   :  { %2084 = vmatpush3.bf16.msra.mxu0 %v2438_v2  ;;  %2087 = vmatprep.mubr.msk.bf16.mxu0 %vm2361_vm0, %v2360_v0 }
 0xdf2   :  { %2085 = vmatprep.subr.bf16.mxu0 %v2360_v0 }
 0xdf5   :  { %2086 = vmatpush3.bf16.msra.mxu0 %v2447_v4 }
 0xdf6   :  { %2099 = vmatprep.subr.bf16.mxu0 %v2360_v0 }
 0xeb3   :  { %v1083_v21 = vpop.f32.mrb[28].mxu1 }
 0xeb4   :  { %v1090_v23 = vadd.f32 %v1083_v21, %v179_v18  ;;  %v2065_v19 = vpop.f32.mrb[29].mxu1 }
 0xeb5   :  { %v1086_v20 = vpop.f32.mrb[30].mxu1 }
 0xeb6   :  { %2249 = vtanh.f32 %v1090_v23  ;;  %v2066_v24 = vpop.f32.mrb[31].mxu1  ;;  %v1841_v36 = vmul.f32 -1.442695, %v1090_v23 }
 0xebb   :  { %v1196_v25 = vpop.f32.mrb[32].mxu1 }
 0xebc   :  { %v2081_v2 = vpop.f32.mrb[33].mxu1 }
 0xebd   :  { %v1199_v26 = vpop.f32.mrb[34].mxu1 }
 0xebe   :  { %v2082_v27 = vpop.f32.mrb[35].mxu1 }
 0xec0   :  { %v2250_v22 = vpop.eup %2249 }
 0xec1   :  { %1100 = vrot.lane.b32.xlu0 %v2250_v22, %s2358_s19 }
 0xec3   :  { %v1156_v28 = vpop.f32.mrb[32].mxu0 }
 0xec4   :  { %v1197_v30 = vadd.f32 %v1196_v25, %v1156_v28  ;;  %v2073_v31 = vpop.f32.mrb[33].mxu0 }
 0xec5   :  { %v1159_v32 = vpop.f32.mrb[34].mxu0 }
 0xec6   :  { %v1202_v34 = vadd.f32 %v2553_v54, %v1197_v30  ;;  %v2074_v40 = vpop.f32.mrb[35].mxu0 }
 0xec8   :  { %2251 = vtanh.f32 %v1202_v34  ;;  %v1844_v45 = vmul.f32 -1.442695, %v1202_v34 }
 0xec9   :  { %2253 = vpow2.f32 %v1841_v36 }
 0xed2   :  { %v2252_v35 = vpop.eup %2251 }
 0xed3   :  { %1212 = vrot.lane.b32.xlu1 %v2252_v35, %s2358_s19  ;;  %v2254_v42 = vpop.eup %2253 }
 0xed4   :  { %v1094_v44 = vadd.f32 1.0, %v2254_v42 }
 0xed6   :  { %2255 = vrcp.f32 %v1094_v44 }
 0xed7   :  { %2257 = vpow2.f32 %v1844_v45 }
 0xee0   :  { %v2256_v46 = vpop.eup %2255 }
 0xee1   :  { %v2258_v38 = vpop.eup %2257  ;;  %v1098_v14 = vmul.f32 %v2256_v46, %v2680_v62 }
 0xee2   :  { %v1206_v49 = vadd.f32 1.0, %v2258_v38 }
 0xee4   :  { %2259 = vrcp.f32 %v1206_v49 }
 0xeee   :  { %v2260_v50 = vpop.eup %2259 }
 0xeef   :  { %v1210_v57 = vmul.f32 %v2260_v50, %v2685_v5 }
 0xf33   :  { %v1101_v47 = vpop.permute.xlu0 %1100 }
 0xf34   :  { %v1103_v48 = vmul.f32 %v2256_v46, %v1101_v47 }
 0xf36   :  { %1105 = vrot.lane.b32.xlu0 %v1103_v48, %s2363_s14 }
 0xf45   :  { %v1213_v51 = vpop.permute.xlu1 %1212 }
 0xf46   :  { %v1215_v52 = vmul.f32 %v2260_v50, %v1213_v51 }
 0xf48   :  { %1217 = vrot.lane.b32.xlu1 %v1215_v52, %s2363_s14 }
 0xfa8   :  { %v1106_v53 = vpop.permute.xlu0 %1105 }
 0xfa9   :  { %v2720_v55 = vadd.f32 %v1106_v53, %v1098_v14 }
 0xfab   :  { %2261 = vtanh.f32 %v2720_v55 }
 0xfb5   :  { %v2262_v56 = vpop.eup %2261 }
 0xfb6   :  { %1111 = vrot.lane.b32.xlu0 %v2262_v56, %s2358_s19 }
 0xfba   :  { %v1218_v58 = vpop.permute.xlu1 %1217 }
 0xfbb   :  { %v2725_v9 = vadd.f32 %v1218_v58, %v1210_v57  ;;  %v2306_v58 = vld [vmem:[%s2843_s5] sm:$0xff]  }
 0xfbd   :  { %2263 = vtanh.f32 %v2725_v9 }
 0xfc7   :  { %v2264_v59 = vpop.eup %2263 }
 0xfc8   :  { %1223 = vrot.lane.b32.xlu1 %v2264_v59, %s2358_s19 }
0x1028   :  { %v1112_v60 = vpop.permute.xlu0 %1111 }
0x1029   :  { %v1114_v61 = vmul.f32 %v2256_v46, %v1112_v60 }
0x102b   :  { %v1227_v62 = vpack.c.bf16 %v1114_v61, %v1114_v61 }
0x102d   :  { %1229 = vrot.lane.b32.xlu0 %v1227_v62, %s2363_s14 }
0x103a   :  { %v1224_v63 = vpop.permute.xlu1 %1223 }
0x103b   :  { %v1226_v1 = vmul.f32 %v2260_v50, %v1224_v63 }
0x103d   :  { %v1300_v3 = vpack.c.bf16 %v1226_v1, %v1226_v1 }
0x103f   :  { %1302 = vrot.lane.b32.xlu1 %v1300_v3, %s2363_s14 }
0x109f   :  { %v1230_v6 = vpop.permute.xlu0 %1229 }
0x10a0   :  { %2088 = vmatmul.mubr.msk.bf16.vlgmr.msra.gmra.mrb[36].mxu0 %vm112_vm1, %v1230_v6 }
0x10a1   :  { %2100 = vmatpush3.bf16.msra.mxu0 %v2527_v41  ;;  %2103 = vmatprep.mubr.msk.bf16.mxu0 %vm2361_vm0, %v2360_v0 }
0x10a2   :  { %2101 = vmatprep.subr.bf16.mxu0 %v2360_v0 }
0x10a5   :  { %2102 = vmatpush3.bf16.msra.mxu0 %v2534_v43 }
0x10a6   :  { %2115 = vmatprep.subr.bf16.mxu0 %v2360_v0 }
0x10a8   :  { %2104 = vmatmul.mubr.msk.bf16.vlgmr.msra.gmra.mrb[40].mxu0 %vm112_vm1, %v1230_v6 }
0x10a9   :  { %2116 = vmatpush3.bf16.msra.mxu0 %v2487_v29  ;;  %2119 = vmatprep.mubr.msk.bf16.mxu0 %vm2361_vm0, %v2360_v0  ;;  %v184_v29 = vadd.f32 %v2516_v37, %v2470_v8 }
0x10aa   :  { %2117 = vmatprep.subr.bf16.mxu0 %v2360_v0 }
0x10ad   :  { %2118 = vmatpush3.bf16.msra.mxu0 %v2505_v33 }
0x10ae   :  { %2131 = vmatprep.subr.bf16.mxu0 %v2360_v0 }
0x10b1   :  { %v1303_v5 = vpop.permute.xlu1 %1302 }
0x10b2   :  { %2096 = vmatmul.mubr.msk.bf16.vlgmr.msra.gmra.mrb[36].mxu1 %vm112_vm1, %v1303_v5 }
0x10b3   :  { %2108 = vmatpush3.bf16.msra.mxu1 %v2305_v10  ;;  %2111 = vmatprep.mubr.msk.bf16.mxu1 %vm2361_vm0, %v2360_v0 }
0x10b4   :  { %2109 = vmatprep.subr.bf16.mxu1 %v2360_v0 }
0x10b7   :  { %2110 = vmatpush3.bf16.msra.mxu1 %v2447_v4 }
0x10b8   :  { %2123 = vmatprep.subr.bf16.mxu1 %v2360_v0 }
0x1173   :  { %v1268_v7 = vpop.f32.mrb[36].mxu0 }
0x1174   :  { %v1275_v11 = vadd.f32 %v1268_v7, %v184_v29  ;;  %v2089_v12 = vpop.f32.mrb[37].mxu0 }
0x1175   :  { %v1271_v16 = vpop.f32.mrb[38].mxu0 }
0x1176   :  { %2265 = vtanh.f32 %v1275_v11  ;;  %v2090_v17 = vpop.f32.mrb[39].mxu0  ;;  %v1846_v2 = vmul.f32 -1.442695, %v1275_v11 }
0x117b   :  { %v1381_v15 = vpop.f32.mrb[40].mxu0 }
0x117c   :  { %v2105_v13 = vpop.f32.mrb[41].mxu0 }
0x117d   :  { %v1384_v18 = vpop.f32.mrb[42].mxu0 }
0x117e   :  { %v2106_v21 = vpop.f32.mrb[43].mxu0 }
0x1180   :  { %v2266_v23 = vpop.eup %2265 }
0x1181   :  { %1285 = vrot.lane.b32.xlu0 %v2266_v23, %s2358_s19 }
0x1185   :  { %v1341_v19 = vpop.f32.mrb[36].mxu1 }
0x1186   :  { %v1382_v4 = vadd.f32 %v1381_v15, %v1341_v19  ;;  %v2097_v20 = vpop.f32.mrb[37].mxu1 }
0x1187   :  { %v1344_v24 = vpop.f32.mrb[38].mxu1 }
0x1188   :  { %v1387_v25 = vadd.f32 %v2553_v54, %v1382_v4  ;;  %v2098_v8 = vpop.f32.mrb[39].mxu1 }
0x118a   :  { %2267 = vtanh.f32 %v1387_v25  ;;  %v1849_v22 = vmul.f32 -1.442695, %v1387_v25 }
0x118b   :  { %2269 = vpow2.f32 %v1846_v2 }
0x1194   :  { %v2268_v37 = vpop.eup %2267 }
0x1195   :  { %1397 = vrot.lane.b32.xlu1 %v2268_v37, %s2358_s19  ;;  %v2270_v26 = vpop.eup %2269 }
0x1196   :  { %v1279_v27 = vadd.f32 1.0, %v2270_v26 }
0x1198   :  { %2271 = vrcp.f32 %v1279_v27 }
0x1199   :  { %2273 = vpow2.f32 %v1849_v22 }
0x11a2   :  { %v2272_v28 = vpop.eup %2271 }
0x11a3   :  { %v2274_v32 = vpop.eup %2273  ;;  %v1283_v42 = vmul.f32 %v2272_v28, %v2720_v55 }
0x11a4   :  { %v1391_v34 = vadd.f32 1.0, %v2274_v32 }
0x11a6   :  { %2275 = vrcp.f32 %v1391_v34 }
0x11b0   :  { %v2276_v40 = vpop.eup %2275 }
0x11b1   :  { %v1395_v47 = vmul.f32 %v2276_v40, %v2725_v9 }
0x11f3   :  { %v1286_v30 = vpop.permute.xlu0 %1285 }
0x11f4   :  { %v1288_v31 = vmul.f32 %v2272_v28, %v1286_v30 }
0x11f6   :  { %1290 = vrot.lane.b32.xlu0 %v1288_v31, %s2363_s14 }
0x1207   :  { %v1398_v35 = vpop.permute.xlu1 %1397 }
0x1208   :  { %v1400_v36 = vmul.f32 %v2276_v40, %v1398_v35 }
0x120a   :  { %1402 = vrot.lane.b32.xlu1 %v1400_v36, %s2363_s14 }
0x1268   :  { %v1291_v44 = vpop.permute.xlu0 %1290 }
0x1269   :  { %v2762_v45 = vadd.f32 %v1291_v44, %v1283_v42 }
0x126b   :  { %2277 = vtanh.f32 %v2762_v45 }
0x1275   :  { %v2278_v46 = vpop.eup %2277 }
0x1276   :  { %1296 = vrot.lane.b32.xlu0 %v2278_v46, %s2358_s19 }
0x127c   :  { %v1403_v38 = vpop.permute.xlu1 %1402 }
0x127d   :  { %v2767_v48 = vadd.f32 %v1403_v38, %v1395_v47 }
0x127f   :  { %2279 = vtanh.f32 %v2767_v48 }
0x1289   :  { %v2280_v49 = vpop.eup %2279 }
0x128a   :  { %1408 = vrot.lane.b32.xlu1 %v2280_v49, %s2358_s19 }
0x12e8   :  { %v1297_v50 = vpop.permute.xlu0 %1296 }
0x12e9   :  { %v1299_v51 = vmul.f32 %v2272_v28, %v1297_v50 }
0x12eb   :  { %v1412_v52 = vpack.c.bf16 %v1299_v51, %v1299_v51  ;;  %v2308_v51 = vld [vmem:[%s2844_s6] ss:$0 sm:$0xff] }
0x12ed   :  { %1414 = vrot.lane.b32.xlu0 %v1412_v52, %s2363_s14 }
0x12fc   :  { %v1409_v14 = vpop.permute.xlu1 %1408 }
0x12fd   :  { %v1411_v53 = vmul.f32 %v2276_v40, %v1409_v14 }
0x12ff   :  { %v1485_v55 = vpack.c.bf16 %v1411_v53, %v1411_v53 }
0x1301   :  { %1487 = vrot.lane.b32.xlu1 %v1485_v55, %s2363_s14 }
0x135f   :  { %v1415_v56 = vpop.permute.xlu0 %1414 }
0x1360   :  { %2112 = vmatmul.mubr.msk.bf16.vlgmr.msra.gmra.mrb[40].mxu1 %vm112_vm1, %v1415_v56 }
0x1361   :  { %2124 = vmatpush3.bf16.msra.mxu1 %v2527_v41  ;;  %2127 = vmatprep.mubr.msk.bf16.mxu1 %vm2361_vm0, %v2360_v0 }
0x1362   :  { %2125 = vmatprep.subr.bf16.mxu1 %v2360_v0 }
0x1365   :  { %2126 = vmatpush3.bf16.msra.mxu1 %v2534_v43 }
0x1366   :  { %2139 = vmatprep.subr.bf16.mxu1 %v2360_v0 }
0x1368   :  { %2128 = vmatmul.mubr.msk.bf16.vlgmr.msra.gmra.mrb[44].mxu1 %vm112_vm1, %v1415_v56 }
0x1369   :  { %2140 = vmatpush3.bf16.msra.mxu1 %v2527_v41  ;;  %2143 = vmatprep.mubr.msk.bf16.mxu1 %vm2361_vm0, %v2360_v0  ;;  %v2307_v41 = vld [vmem:[%s2841_s3] ss:$0 sm:$0xff] }
0x136a   :  { %2141 = vmatprep.subr.bf16.mxu1 %v2360_v0 }
0x136d   :  { %2142 = vmatpush3.bf16.msra.mxu1 %v2534_v43  ;;  %v187_v43 = vadd.f32 %v2307_v41, %v2520_v39 }
0x1373   :  { %v1488_v57 = vpop.permute.xlu1 %1487 }
0x1374   :  { %2120 = vmatmul.mubr.msk.bf16.vlgmr.msra.gmra.mrb[44].mxu0 %vm112_vm1, %v1488_v57 }
0x1375   :  { %2132 = vmatpush3.bf16.msra.mxu0 %v2306_v58  ;;  %2135 = vmatprep.mubr.msk.bf16.mxu0 %vm2361_vm0, %v2360_v0 }
0x1376   :  { %2133 = vmatprep.subr.bf16.mxu0 %v2360_v0 }
0x1379   :  { %2134 = vmatpush3.bf16.msra.mxu0 %v2505_v33 }
0x137a   :  { %2147 = vmatprep.subr.bf16.mxu0 %v2360_v0 }
0x1433   :  { %v1453_v9 = vpop.f32.mrb[40].mxu1 }
0x1434   :  { %v1460_v59 = vadd.f32 %v1453_v9, %v187_v43  ;;  %v2113_v60 = vpop.f32.mrb[41].mxu1 }
0x1435   :  { %v1456_v61 = vpop.f32.mrb[42].mxu1 }
0x1436   :  { %2281 = vtanh.f32 %v1460_v59  ;;  %v2114_v62 = vpop.f32.mrb[43].mxu1  ;;  %v1851_v16 = vmul.f32 -1.442695, %v1460_v59  ;;  %v2175_v61 = vld [vmem:[#allocation3] sm:$0xff]  }
0x1437   :  { %v2176_v62 = vld [vmem:[#allocation3 + $0x8] sm:$0xff]  }
0x143b   :  { %v1566_v63 = vpop.f32.mrb[44].mxu1 }
0x143c   :  { %v2129_v1 = vpop.f32.mrb[45].mxu1 }
0x143d   :  { %v1569_v3 = vpop.f32.mrb[46].mxu1 }
0x143e   :  { %v2130_v6 = vpop.f32.mrb[47].mxu1 }
0x1440   :  { %v2282_v5 = vpop.eup %2281 }
0x1441   :  { %1470 = vrot.lane.b32.xlu0 %v2282_v5, %s2358_s19 }
0x1447   :  { %v1526_v33 = vpop.f32.mrb[44].mxu0 }
0x1448   :  { %v1567_v10 = vadd.f32 %v1566_v63, %v1526_v33  ;;  %v2121_v29 = vpop.f32.mrb[45].mxu0  ;;  %v1858_v33 = vld [vmem:[%s2846_s8] ss:$0 sm:$0xff] }
0x1449   :  { %v1529_v7 = vpop.f32.mrb[46].mxu0 }
0x144a   :  { %v1572_v11 = vadd.f32 %v2553_v54, %v1567_v10  ;;  %v2122_v39 = vpop.f32.mrb[47].mxu0 }
0x144c   :  { %2283 = vtanh.f32 %v1572_v11  ;;  %v1854_v13 = vmul.f32 -1.442695, %v1572_v11 }
0x144d   :  { %2285 = vpow2.f32 %v1851_v16 }
0x1456   :  { %v2284_v12 = vpop.eup %2283 }
0x1457   :  { %1582 = vrot.lane.b32.xlu1 %v2284_v12, %s2358_s19  ;;  %v2286_v17 = vpop.eup %2285 }
0x1458   :  { %v1464_v15 = vadd.f32 1.0, %v2286_v17 }
0x145a   :  { %2287 = vrcp.f32 %v1464_v15 }
0x145b   :  { %2289 = vpow2.f32 %v1854_v13 }
0x1464   :  { %v2288_v18 = vpop.eup %2287 }
0x1465   :  { %v2290_v19 = vpop.eup %2289  ;;  %v1468_v25 = vmul.f32 %v2288_v18, %v2762_v45 }
0x1466   :  { %v1576_v4 = vadd.f32 1.0, %v2290_v19 }
0x1468   :  { %2291 = vrcp.f32 %v1576_v4 }
0x1472   :  { %v2292_v54 = vpop.eup %2291 }
0x1473   :  { %v1580_v26 = vmul.f32 %v2292_v54, %v2767_v48 }
0x14b3   :  { %v1471_v21 = vpop.permute.xlu0 %1470 }
0x14b4   :  { %v1473_v23 = vmul.f32 %v2288_v18, %v1471_v21 }
0x14b6   :  { %1475 = vrot.lane.b32.xlu0 %v1473_v23, %s2363_s14 }
0x14c9   :  { %v1583_v20 = vpop.permute.xlu1 %1582 }
0x14ca   :  { %v1585_v24 = vmul.f32 %v2292_v54, %v1583_v20 }
0x14cc   :  { %1587 = vrot.lane.b32.xlu1 %v1585_v24, %s2363_s14 }
0x1528   :  { %v1476_v8 = vpop.permute.xlu0 %1475 }
0x1529   :  { %v1478_v37 = vadd.f32 %v1476_v8, %v1468_v25 }
0x152b   :  { %2293 = vtanh.f32 %v1478_v37 }
0x1535   :  { %v2294_v2 = vpop.eup %2293 }
0x1536   :  { %1481 = vrot.lane.b32.xlu0 %v2294_v2, %s2358_s19 }
0x153e   :  { %v1588_v27 = vpop.permute.xlu1 %1587 }
0x153f   :  { %v1590_v22 = vadd.f32 %v1588_v27, %v1580_v26 }
0x1541   :  { %2295 = vtanh.f32 %v1590_v22 }
0x154b   :  { %v2296_v28 = vpop.eup %2295 }
0x154c   :  { %1593 = vrot.lane.b32.xlu1 %v2296_v28, %s2358_s19 }
0x15a8   :  { %v1482_v30 = vpop.permute.xlu0 %1481 }
0x15a9   :  { %v1484_v31 = vmul.f32 %v2288_v18, %v1482_v30 }
0x15ab   :  { %v1644_v32 = vpack.c.bf16 %v1484_v31, %v1484_v31 }
0x15ad   :  { %1646 = vrot.lane.b32.xlu1 %v1644_v32, %s2363_s14 }
0x15be   :  { %v1594_v34 = vpop.permute.xlu1 %1593 }
0x15bf   :  { %v1596_v40 = vmul.f32 %v2292_v54, %v1594_v34 }
0x15c1   :  { %v1597_v35 = vpack.c.bf16 %v1596_v40, %v1596_v40 }
0x15c3   :  { %1599 = vrot.lane.b32.xlu0 %v1597_v35, %s2363_s14 }
0x161f   :  { %v1647_v36 = vpop.permute.xlu1 %1646 }
0x1620   :  { %2144 = vmatmul.mubr.msk.bf16.vlgmr.msra.gmra.mrb[48].mxu1 %vm112_vm1, %v1647_v36 }
0x1635   :  { %v1600_v42 = vpop.permute.xlu0 %1599 }
0x1636   :  { %2136 = vmatmul.mubr.msk.bf16.vlgmr.msra.gmra.mrb[48].mxu0 %vm112_vm1, %v1600_v42 }
0x1637   :  { %2151 = vmatprep.mubr.msk.bf16.mxu0 %vm2361_vm0, %v2360_v0  ;;  %2148 = vmatpush3.bf16.msra.mxu0 %v2175_v61 }
0x1638   :  { %2149 = vmatprep.subr.bf16.mxu0 %v2360_v0 }
0x163b   :  { %2150 = vmatpush3.bf16.msra.mxu0 %v2176_v62 }
0x16f3   :  { %v1685_v44 = vpop.f32.mrb[48].mxu1 }
0x16f4   :  { %v2145_v45 = vpop.f32.mrb[49].mxu1 }
0x16f5   :  { %v1688_v46 = vpop.f32.mrb[50].mxu1 }
0x16f6   :  { %v2146_v47 = vpop.f32.mrb[51].mxu1 }
0x1709   :  { %v1638_v38 = vpop.f32.mrb[48].mxu0 }
0x170a   :  { %v1686_v48 = vadd.f32 %v1685_v44, %v1638_v38  ;;  %v2137_v49 = vpop.f32.mrb[49].mxu0 }
0x170b   :  { %v1641_v50 = vpop.f32.mrb[50].mxu0 }
0x170c   :  { %v1691_v52 = vadd.f32 %v2308_v51, %v1686_v48  ;;  %v2138_v14 = vpop.f32.mrb[51].mxu0 }
0x170e   :  { %2297 = vtanh.f32 %v1691_v52  ;;  %v1857_v55 = vmul.f32 -1.442695, %v1691_v52 }
0x1710   :  { %2299 = vpow2.f32 %v1857_v55 }
0x1718   :  { %v2298_v53 = vpop.eup %2297 }
0x1719   :  { %1701 = vrot.lane.b32.xlu0 %v2298_v53, %s2358_s19 }
0x171a   :  { %v2300_v56 = vpop.eup %2299 }
0x171b   :  { %v1695_v57 = vadd.f32 1.0, %v2300_v56 }
0x171d   :  { %2301 = vrcp.f32 %v1695_v57 }
0x1727   :  { %v2302_v58 = vpop.eup %2301 }
0x1728   :  { %v1699_v9 = vmul.f32 %v2302_v58, %v1590_v22 }
0x178b   :  { %v1702_v41 = vpop.permute.xlu0 %1701 }
0x178c   :  { %v1704_v43 = vmul.f32 %v2302_v58, %v1702_v41 }
0x178e   :  { %1706 = vrot.lane.b32.xlu1 %v1704_v43, %s2363_s14 }
0x1800   :  { %v1707_v59 = vpop.permute.xlu1 %1706 }
0x1801   :  { %v1709_v60 = vadd.f32 %v1707_v59, %v1699_v9 }
0x1803   :  { %2303 = vtanh.f32 %v1709_v60 }
0x180d   :  { %v2304_v63 = vpop.eup %2303 }
0x180e   :  { %1712 = vrot.lane.b32.xlu0 %v2304_v63, %s2358_s19  ;;  %s2331_s19 = scalar_lea.vmem %s1794_s1, 128 }
0x180f   :  { %p2332_p8 = scmp.ne.s32.totalorder %s1794_s1, %s2331_s19  ;;  %p2337_p10 = scmp.lt.s32.totalorder %s2331_s19, %s2331_s19 }
0x1811   :  { %p2338_p11 = por %p2337_p10, %p2336_p9 }
0x1813   :  { %p2339_p12 = pnand %p2338_p11, %p2332_p8 }
0x1880   :  { %v1713_v1 = vpop.permute.xlu0 %1712 }
0x1881   :  { %v1715_v3 = vmul.f32 %v2302_v58, %v1713_v1 }
0x1883   :  { %v1716_v6 = vpack.c.bf16 %v1715_v3, %v1715_v3 }
0x1885   :  { %1729 = vrot.lane.b32.xlu1 %v1716_v6, %s2363_s14 }
0x18f7   :  { %v1730_v5 = vpop.permute.xlu1 %1729 }
0x18f8   :  { %2152 = vmatmul.mubr.msk.bf16.vlgmr.msra.gmra.mrb[52].mxu0 %vm112_vm1, %v1730_v5 }
0x19cb   :  { %v1780_v10 = vpop.f32.mrb[52].mxu0 }
0x19cc   :  { %v1781_v0 = vadd.f32 %v1858_v33, %v1780_v10  ;;  %v2153_v29 = vpop.f32.mrb[53].mxu0 }
0x19cd   :  { %v1783_v7 = vpop.f32.mrb[54].mxu0 }
0x19ce   :  { %1786 = vst [vmem:[#allocation6] sm:$0xff] %v1781_v0  ;;  %v2154_v11 = vpop.f32.mrb[55].mxu0 }
0x19cf   :  { %2342 = shalt.err (!%p2339_p12)
}
0x19d0   :  { %s2343_s8 = scalar_lea.hbm %s2847_s9, 128 }
0x19d1   :  { %p2344_p13 = scmp.ne.s32.totalorder %s2847_s9, %s2343_s8  ;;  %p2347_p0 = scmp.lt.u32.totalorder %s2343_s8, %s2847_s9 }
0x19d3   :  { %p2349_p1 = pnand %p2347_p0, %p2344_p13 }
0x19d5   :  { %2352 = shalt.err (!%p2349_p1)
}
0x19d6   :  { %1796 = dma.vmem_to_hbm [thread:$0]  %s1794_s1, 128, %s2847_s9, [#allocation5]  }
0x19d7   :  { %2355 = dma.done.wait [#allocation5], 128  }
0x19d8   :  { %2356 = vsyncadd [#allocation5], 4294967168 }
0x19d9   :  { %1800 = vsyncpa [#allocation4], 1 }
0x19da   :  { %1801 = vsyncpa [#allocation5], 1 }

</bundles_post_ra>
